<compile_context>
chip_gen: v5e
topology: v5e:2x2
jax: 0.10.0
libtpu: 0.0.40
codegen_flags: <defaults>
</compile_context>

<pallas_src>
import math
import jax
import jax.numpy as jnp
from jax.experimental import pallas as pl
from jax.experimental.pallas import tpu as pltpu


def mlp_stopping_kernel(x_ref, w1_ref, b1_ref, w2_ref, b2_ref, w3_ref, b3_ref, o_ref):
    # x tile: [TILE_N, d] f32 -> bf16 for the MXU (f32 accumulate)
    x = x_ref[...].astype(jnp.bfloat16)

    # a1 (BN1 eval-mode scale folded into w1/b1)
    h = jnp.dot(x, w1_ref[...], preferred_element_type=jnp.float32) + b1_ref[...]
    # leaky_relu (F.leaky_relu default negative_slope = 0.01)
    h = jnp.where(h > 0, h, 0.01 * h)
    # BN1 shift folded into b2; dropout -> identity (eval)

    # a2: bf16 operands, f32 accumulate
    h = jnp.dot(h.astype(jnp.bfloat16), w2_ref[...],
                preferred_element_type=jnp.float32) + b2_ref[...]
    # ReLU; dropout -> identity (eval)
    h = jnp.maximum(h, 0.0)

    # a3 (q2 -> 1): keep off the MXU — VPU multiply + lane reduce
    logits = jnp.sum(h * w3_ref[...], axis=-1, keepdims=True) + b3_ref[...]

    # sigmoid: exp on the EUP + approx reciprocal on the EUP
    o_ref[...] = pl.reciprocal(1.0 + jnp.exp(-logits), approx=True)


def mlp_stopping_forward(x, params):
    """x: [N, d] float32. params: dict produced by init_params()."""
    N, d = x.shape
    q1 = params["w1"].shape[1]
    q2 = params["w2"].shape[1]

    # Large batch tiles amortize the ~0.35us/step overhead; full-N block when small.
    tile_n = 512 if N >= 512 else N
    grid = (pl.cdiv(N, tile_n),)

    resident = lambda shape: pl.BlockSpec(shape, lambda i: (0,) * len(shape))

    return pl.pallas_call(
        mlp_stopping_kernel,
        out_shape=jax.ShapeDtypeStruct((N, 1), jnp.float32),
        grid=grid,
        in_specs=[
            pl.BlockSpec((tile_n, d), lambda i: (i, 0)),   # x: streamed over batch
            resident((d, q1)),                             # w1 (bf16, BN-scaled)
            resident((1, q1)),                             # b1 (BN-scaled)
            resident((q1, q2)),                            # w2 (bf16)
            resident((1, q2)),                             # b2 (+ folded BN shift)
            resident((1, q2)),                             # w3 as a row vector
            resident((1, 1)),                              # b3
        ],
        out_specs=pl.BlockSpec((tile_n, 1), lambda i: (i, 0)),
        compiler_params=pltpu.CompilerParams(
            dimension_semantics=("parallel",)),
    )(x, params["w1"], params["b1"], params["w2"], params["b2"],
      params["w3"], params["b3"])


# ---------------------------------------------------------------------------
# Parameter construction (matches PyTorch inits; BN folded for eval mode).
# ---------------------------------------------------------------------------

def _xavier_uniform(key, fan_in, fan_out):
    # matches nn.init.xavier_uniform_ on a [out, in] weight; emitted transposed
    # as [in, out] for the kernel's x @ W layout.
    bound = math.sqrt(6.0 / (fan_in + fan_out))
    return jax.random.uniform(key, (fan_in, fan_out), jnp.float32, -bound, bound)


def _linear_bias(key, fan_in, fan_out):
    # PyTorch nn.Linear default bias init: U(-1/sqrt(fan_in), 1/sqrt(fan_in))
    bound = 1.0 / math.sqrt(fan_in)
    return jax.random.uniform(key, (1, fan_out), jnp.float32, -bound, bound)


def init_params(key, d, q1, q2, eps=1e-5):
    k1, k2, k3, k4, k5, k6 = jax.random.split(key, 6)
    w1 = _xavier_uniform(k1, d, q1)
    b1 = _linear_bias(k2, d, q1)
    w2 = _xavier_uniform(k3, q1, q2)
    b2 = _linear_bias(k4, q1, q2)
    w3 = _xavier_uniform(k5, q2, 1)
    b3 = _linear_bias(k6, q2, 1)

    # Eval-mode BN1 affine with PyTorch-default running stats
    # (running_mean=0, running_var=1, gamma=1, beta=0).
    run_mean = jnp.zeros((1, q1), jnp.float32)
    run_var = jnp.ones((1, q1), jnp.float32)
    gamma = jnp.ones((1, q1), jnp.float32)
    beta = jnp.zeros((1, q1), jnp.float32)
    bn_scale = gamma / jnp.sqrt(run_var + eps)           # > 0
    bn_shift = beta - run_mean * bn_scale

    # Fold: bn(leaky_relu(x@w1 + b1)) = leaky_relu(x@(w1*s) + b1*s) + shift
    # (valid for s > 0), and the additive shift folds into a2's bias.
    w1f = w1 * bn_scale
    b1f = b1 * bn_scale
    b2f = b2 + bn_shift @ w2

    return {
        "w1": w1f.astype(jnp.bfloat16),     # MXU operand
        "b1": b1f,
        "w2": w2.astype(jnp.bfloat16),      # MXU operand
        "b2": b2f,
        "w3": w3.reshape(1, q2),            # row vector for the VPU reduce
        "b3": b3,
        # unfolded f32 copies kept only for the reference check
        "_ref": {"w1": w1, "b1": b1, "bn_scale": bn_scale, "bn_shift": bn_shift,
                 "w2": w2, "b2": b2, "w3": w3, "b3": b3},
    }


# ---------------------------------------------------------------------------
# References for validation.
# ---------------------------------------------------------------------------

def reference_forward_f32(x, rp):
    """Pure-f32 eval-mode forward of the PyTorch module."""
    h = x @ rp["w1"] + rp["b1"]
    h = jnp.where(h > 0, h, 0.01 * h)
    h = h * rp["bn_scale"] + rp["bn_shift"]
    h = h @ rp["w2"] + rp["b2"]
    h = jnp.maximum(h, 0.0)
    h = h @ rp["w3"] + rp["b3"]
    return jax.nn.sigmoid(h)


def reference_forward_matched(x, p):
    """Mirrors the kernel math (bf16 MXU operands, folded BN, VPU final layer)."""
    h = jnp.dot(x.astype(jnp.bfloat16), p["w1"],
                preferred_element_type=jnp.float32) + p["b1"]
    h = jnp.where(h > 0, h, 0.01 * h)
    h = jnp.dot(h.astype(jnp.bfloat16), p["w2"],
                preferred_element_type=jnp.float32) + p["b2"]
    h = jnp.maximum(h, 0.0)
    h = jnp.sum(h * p["w3"], axis=-1, keepdims=True) + p["b3"]
    return jax.nn.sigmoid(h)


if __name__ == "__main__":
    d, q1, q2 = 32, 64, 32
    N = 1000   # not a multiple of TILE_N: exercises the padded tail block

    key = jax.random.PRNGKey(0)
    kx, kp = jax.random.split(key)
    x = jax.random.normal(kx, (N, d), jnp.float32)
    params = init_params(kp, d, q1, q2)

    out = mlp_stopping_forward(x, params)
    out = jax.block_until_ready(out)
    assert out.shape == (N, 1)

    # Tight-ish check against a reference that uses the same bf16/approx math.
    ref_matched = reference_forward_matched(x, params)
    assert jnp.allclose(out, ref_matched, atol=1e-2), "mismatch vs matched reference"

    # Loose check against the exact f32 eval-mode forward (bf16 operand error only).
    ref_f32 = reference_forward_f32(x, params["_ref"])
    assert jnp.allclose(out, ref_f32, atol=5e-2), "mismatch vs f32 reference"

    print("KERNEL_OK")
</pallas_src>

<mosaic_0001>
module attributes {stable_mosaic.version = 11 : i64} {
  func.func @mlp_stopping_kernel(%arg0: i32, %arg1: memref<512x32xf32, #tpu.memory_space<vmem>>, %arg2: memref<32x64xbf16, #tpu.memory_space<vmem>>, %arg3: memref<1x64xf32, #tpu.memory_space<vmem>>, %arg4: memref<64x32xbf16, #tpu.memory_space<vmem>>, %arg5: memref<1x32xf32, #tpu.memory_space<vmem>>, %arg6: memref<1x32xf32, #tpu.memory_space<vmem>>, %arg7: memref<1x1xf32, #tpu.memory_space<vmem>>, %arg8: memref<512x1xf32, #tpu.memory_space<vmem>>) attributes {dimension_semantics = [#tpu.dimension_semantics<parallel>], iteration_bounds = array<i64: 2>, scalar_prefetch = 0 : i64, scratch_operands = 0 : i64, tpu.core_type = #tpu.core_type<tc>, window_params = [{transform_indices = @transform_0, window_bounds = array<i64: 512, 32>}, {pipeline_mode = #tpu.pipeline_mode<synchronous>, transform_indices = @transform_1, window_bounds = array<i64: 32, 64>}, {pipeline_mode = #tpu.pipeline_mode<synchronous>, transform_indices = @transform_2, window_bounds = array<i64: 1, 64>}, {pipeline_mode = #tpu.pipeline_mode<synchronous>, transform_indices = @transform_3, window_bounds = array<i64: 64, 32>}, {pipeline_mode = #tpu.pipeline_mode<synchronous>, transform_indices = @transform_4, window_bounds = array<i64: 1, 32>}, {pipeline_mode = #tpu.pipeline_mode<synchronous>, transform_indices = @transform_5, window_bounds = array<i64: 1, 32>}, {pipeline_mode = #tpu.pipeline_mode<synchronous>, transform_indices = @transform_6, window_bounds = array<i64: 1, 1>}, {transform_indices = @transform_7, window_bounds = array<i64: 512, 1>}]} {
    %c0 = arith.constant 0 : index
    %c0_0 = arith.constant 0 : index
    %0 = vector.load %arg1[%c0, %c0_0] : memref<512x32xf32, #tpu.memory_space<vmem>>, vector<512x32xf32>
    %1 = arith.truncf %0 : vector<512x32xf32> to vector<512x32xbf16>
    %c0_1 = arith.constant 0 : index
    %c0_2 = arith.constant 0 : index
    %2 = vector.load %arg2[%c0_1, %c0_2] : memref<32x64xbf16, #tpu.memory_space<vmem>>, vector<32x64xbf16>
    %cst = arith.constant dense<0.000000e+00> : vector<512x64xf32>
    %3 = tpu.matmul %1, %2, %cst {dimension_numbers = #tpu.dot_dimension_numbers<[1], [0], [0], [1], [0, 0, 1, 1], [], []>} : vector<512x32xbf16>, vector<32x64xbf16>, vector<512x64xf32> -> vector<512x64xf32>
    %c0_3 = arith.constant 0 : index
    %c0_4 = arith.constant 0 : index
    %4 = vector.load %arg3[%c0_3, %c0_4] : memref<1x64xf32, #tpu.memory_space<vmem>>, vector<1x64xf32>
    %5 = vector.broadcast %4 : vector<1x64xf32> to vector<512x64xf32>
    %6 = arith.addf %3, %5 : vector<512x64xf32>
    %cst_5 = arith.constant 0.000000e+00 : f32
    %7 = vector.broadcast %cst_5 : f32 to vector<512x64xf32>
    %8 = arith.cmpf ogt, %6, %7 : vector<512x64xf32>
    %cst_6 = arith.constant 0.00999999977 : f32
    %9 = vector.broadcast %cst_6 : f32 to vector<512x64xf32>
    %10 = arith.mulf %9, %6 : vector<512x64xf32>
    %11 = arith.select %8, %6, %10 : vector<512x64xi1>, vector<512x64xf32>
    %12 = arith.truncf %11 : vector<512x64xf32> to vector<512x64xbf16>
    %c0_7 = arith.constant 0 : index
    %c0_8 = arith.constant 0 : index
    %13 = vector.load %arg4[%c0_7, %c0_8] : memref<64x32xbf16, #tpu.memory_space<vmem>>, vector<64x32xbf16>
    %cst_9 = arith.constant dense<0.000000e+00> : vector<512x32xf32>
    %14 = tpu.matmul %12, %13, %cst_9 {dimension_numbers = #tpu.dot_dimension_numbers<[1], [0], [0], [1], [0, 0, 1, 1], [], []>} : vector<512x64xbf16>, vector<64x32xbf16>, vector<512x32xf32> -> vector<512x32xf32>
    %c0_10 = arith.constant 0 : index
    %c0_11 = arith.constant 0 : index
    %15 = vector.load %arg5[%c0_10, %c0_11] : memref<1x32xf32, #tpu.memory_space<vmem>>, vector<1x32xf32>
    %16 = vector.broadcast %15 : vector<1x32xf32> to vector<512x32xf32>
    %17 = arith.addf %14, %16 : vector<512x32xf32>
    %cst_12 = arith.constant 0.000000e+00 : f32
    %18 = vector.broadcast %cst_12 : f32 to vector<512x32xf32>
    %19 = arith.maximumf %17, %18 : vector<512x32xf32>
    %c0_13 = arith.constant 0 : index
    %c0_14 = arith.constant 0 : index
    %20 = vector.load %arg6[%c0_13, %c0_14] : memref<1x32xf32, #tpu.memory_space<vmem>>, vector<1x32xf32>
    %21 = vector.broadcast %20 : vector<1x32xf32> to vector<512x32xf32>
    %22 = arith.mulf %19, %21 : vector<512x32xf32>
    %cst_15 = arith.constant dense<0.000000e+00> : vector<512xf32>
    %23 = vector.multi_reduction <add>, %22, %cst_15 [1] : vector<512x32xf32> to vector<512xf32>
    %24 = vector.shape_cast %23 : vector<512xf32> to vector<512x1xf32>
    %c0_16 = arith.constant 0 : index
    %c0_17 = arith.constant 0 : index
    %25 = vector.load %arg7[%c0_16, %c0_17] : memref<1x1xf32, #tpu.memory_space<vmem>>, vector<1x1xf32>
    %26 = vector.broadcast %25 : vector<1x1xf32> to vector<512x1xf32>
    %27 = arith.addf %24, %26 : vector<512x1xf32>
    %cst_18 = arith.constant 0.000000e+00 : f32
    %28 = vector.broadcast %cst_18 : f32 to vector<512x1xf32>
    %29 = arith.subf %28, %27 : vector<512x1xf32>
    %30 = math.exp %29 : vector<512x1xf32>
    %cst_19 = arith.constant 1.000000e+00 : f32
    %31 = vector.broadcast %cst_19 : f32 to vector<512x1xf32>
    %32 = arith.addf %31, %30 : vector<512x1xf32>
    %33 = tpu.reciprocal %32 {approx = true} : vector<512x1xf32> -> vector<512x1xf32>
    %c0_20 = arith.constant 0 : index
    %c0_21 = arith.constant 0 : index
    %34 = vector.load %arg8[%c0_20, %c0_21] : memref<512x1xf32, #tpu.memory_space<vmem>>, vector<512x1xf32>
    tpu.vector_store %arg8[%c0_20, %c0_21], %33 {strides = array<i32>} : memref<512x1xf32, #tpu.memory_space<vmem>>, vector<512x1xf32>,
    return
  }
  func.func @transform_0(%arg0: i32) -> (i32, i32) {
    %c0_i32 = arith.constant 0 : i32
    %c0_i32_0 = arith.constant 0 : i32
    return %arg0, %c0_i32 : i32, i32
  }
  func.func @transform_1(%arg0: i32) -> (i32, i32) {
    %c0_i32 = arith.constant 0 : i32
    %c0_i32_0 = arith.constant 0 : i32
    %c0_i32_1 = arith.constant 0 : i32
    return %c0_i32, %c0_i32_0 : i32, i32
  }
  func.func @transform_2(%arg0: i32) -> (i32, i32) {
    %c0_i32 = arith.constant 0 : i32
    %c0_i32_0 = arith.constant 0 : i32
    %c0_i32_1 = arith.constant 0 : i32
    return %c0_i32, %c0_i32_0 : i32, i32
  }
  func.func @transform_3(%arg0: i32) -> (i32, i32) {
    %c0_i32 = arith.constant 0 : i32
    %c0_i32_0 = arith.constant 0 : i32
    %c0_i32_1 = arith.constant 0 : i32
    return %c0_i32, %c0_i32_0 : i32, i32
  }
  func.func @transform_4(%arg0: i32) -> (i32, i32) {
    %c0_i32 = arith.constant 0 : i32
    %c0_i32_0 = arith.constant 0 : i32
    %c0_i32_1 = arith.constant 0 : i32
    return %c0_i32, %c0_i32_0 : i32, i32
  }
  func.func @transform_5(%arg0: i32) -> (i32, i32) {
    %c0_i32 = arith.constant 0 : i32
    %c0_i32_0 = arith.constant 0 : i32
    %c0_i32_1 = arith.constant 0 : i32
    return %c0_i32, %c0_i32_0 : i32, i32
  }
  func.func @transform_6(%arg0: i32) -> (i32, i32) {
    %c0_i32 = arith.constant 0 : i32
    %c0_i32_0 = arith.constant 0 : i32
    %c0_i32_1 = arith.constant 0 : i32
    return %c0_i32, %c0_i32_0 : i32, i32
  }
  func.func @transform_7(%arg0: i32) -> (i32, i32) {
    %c0_i32 = arith.constant 0 : i32
    %c0_i32_0 = arith.constant 0 : i32
    return %arg0, %c0_i32 : i32, i32
  }
}

</mosaic_0001>

<bundles_post_ra>
// kernel: tpu_custom_call.1
= control target key start
LH: loop header
LB: loop body
LE: loop exit
PB: predicated region body
PF: predicated region fallthrough
CT: control target
= control target key end

     0   :  { %s3828_s0 = inlined_call_operand.vmem [shape: f32[1000,32], index: 0, kind: input, shape index: {}]   ;;  %s3829_s1 = inlined_call_operand.vmem [shape: bf16[32,64], index: 1, kind: input, shape index: {}]   ;;  %s3830_s2 = inlined_call_operand.vmem [shape: f32[1,64], index: 2, kind: input, shape index: {}]   ;;  %s3831_s3 = inlined_call_operand.vmem [shape: bf16[64,32], index: 3, kind: input, shape index: {}]   ;;  %s3832_s4 = inlined_call_operand.vmem [shape: f32[1,32], index: 4, kind: input, shape index: {}]   ;;  %s3833_s5 = inlined_call_operand.vmem [shape: f32[1,32], index: 5, kind: input, shape index: {}]   ;;  %s3834_s6 = inlined_call_operand.<no memory space> [shape: f32[1,1], index: 6, kind: input, shape index: {}]   ;;  %s3835_s7 = inlined_call_operand.vmem [shape: f32[1000,1], index: 7, kind: output, shape index: {}]  }
   0x1   :  { %v12_v0 = vstv %s3834_s6 }
   0x2   :  { %13 = vst [vmem:[#allocation2] sm:$0x1] %v12_v0 }
   0x3   :  { %s2941_s26 = smov 0   ;;  %s2943_s27 = smov 0  }
   0x4   :  { %s2945_s28 = smov 0  }
   0x5 LB: > { %s2954_s6 = sadd.s32 4294967295, %s2864_s28   ;;  %s2956_s29 = sadd.s32 1, %s2864_s28   ;;  %s2864_s28 = sphi %s2945_s28, %s3844_s28   ;;  %s2860_s27 = sphi %s2943_s27, %s3843_s27   ;;  %s2856_s26 = sphi %s2941_s26, %s3842_s26  }
   0x6   : > { %s175_s30 = ssub.s32 %s2864_s28, %s2956_s29  ;;  %s178_s8 = sadd.s32 1, %s2860_s27 }
   0x7   : > { %p176_p0 = scmp.eq.s32.totalorder %s175_s30, 0  ;;  %p188_p1 = scmp.ne.s32.totalorder %s2860_s27, %s2856_s26 }
   0x8   : > { %p189_p2 = scmp.eq.s32.totalorder %s2954_s6, 1  ;;  %p2331_p3 = scmp.ge.s32.totalorder %s2864_s28, 1 }
   0x9   : > { %s2964_s9 = scalar_select %p176_p0, %s2860_s27, %s178_s8  }
   0xa   : > { %p2966_p4 = por %p189_p2, %p188_p1  ;;  %p248_p5 = scmp.lt.s32.totalorder %s2864_s28, 3 }
   0xc   : > { %p249_p6 = pnand %p2331_p3, %p248_p5 }
   0xd   : > { %s2974_s13 = sshll.u32 (!%p249_p6), %s2954_s6, 6  ;;  %s280_s18 = sand.u32 (!%p249_p6), 1, %s2856_s26  }
   0xe   : > { %252 = sbr.rel (%p249_p6) target bundleno = 1014 (0x3f6), region = 48  ;;  %p288_p7 = scmp.lt.s32.totalorder (!%p249_p6), %s2974_s13, 124 }
   0xf   : > { %s2332_s19 = sshll.u32 (!%p249_p6), %s280_s18, 9 }
  0x10   : > { %s3230_s26 = scalar_lea.vmem (!%p249_p6), [#allocation3], %s2332_s19  }
  0x13   : > { %v2441_v1 = vld [vmem:[%s3829_s1 + $0x8] sm:$0xff]  ;;  %v2440_v2 = vld [vmem:[%s3829_s1] sm:$0xff]  ;;  %s289_s16 = scalar_select %p288_p7, %s2974_s13, 124  ;;  %vm419_vm0 = vcmask 261120   ;;  %v2445_v24 = vld [vmem:[%s3831_s3 + $0x18] sm:$0xff]  ;;  %vm945_vm3 = vcmask 523264  }
  0x14   : > { %522 = vmatpush.bf16.msra.mxu0 %v2441_v1  ;;  %2449 = vmatpush.bf16.msra.mxu3 %v2441_v1  ;;  %v2444_v25 = vld [vmem:[%s3831_s3 + $0x10] sm:$0xff]  ;;  %v2443_v26 = vld [vmem:[%s3831_s3 + $0x8] sm:$0xff]  ;;  %v2442_v27 = vld [vmem:[%s3831_s3] sm:$0xff]  ;;  %s1996_s12 = ssub.s32 (%p2966_p4), 125, %s2974_s13  ;;  %s2446_s14 = sshll.u32 (%p2966_p4), %s2954_s6, 9 }
  0x15   : > { %s2334_s17 = sshll.u32 %s289_s16, 3  ;;  %1046 = vmatpush.bf16.msra.mxu1 %v2445_v24  ;;  %2451 = vmatpush.bf16.msra.mxu2 %v2445_v24  ;;  %v3027_v35 = vld [vmem:[%s3830_s2] ss:$0 sm:$0xff]  ;;  %p1997_p8 = scmp.lt.s32.totalorder (%p2966_p4), %s1996_s12, 64 }
  0x16   : > { %s2984_s20 = scalar_lea.vmem %s3828_s0, %s2334_s17  ;;  %s3693_s17 = scalar_lea.vmem (%p2966_p4), %s3835_s7, %s2446_s14  }
  0x17   : > { %v303_v3 = vld [vmem:[%s2984_s20] sm:$0xff]  ;;  %v304_v4 = vld [vmem:[%s2984_s20 + $0x8] sm:$0xff]  ;;  %v305_v6 = vld [vmem:[%s2984_s20 + $0x10] sm:$0xff] }
  0x18   : > { %523 = vmatpush.bf16.msra.mxu0 %v2440_v2  ;;  %2450 = vmatpush.bf16.msra.mxu3 %v2440_v2  ;;  %v367_v5 = vpack.c.bf16 %v304_v4, %v303_v3  ;;  %v306_v7 = vld [vmem:[%s2984_s20 + $0x18] sm:$0xff]  ;;  %v307_v9 = vld [vmem:[%s2984_s20 + $0x20] sm:$0xff]  ;;  %v308_v10 = vld [vmem:[%s2984_s20 + $0x28] sm:$0xff] }
  0x19   : > { %v368_v8 = vpack.c.bf16 %v306_v7, %v305_v6  ;;  %v369_v11 = vpack.c.bf16 %v308_v10, %v307_v9  ;;  %v309_v12 = vld [vmem:[%s2984_s20 + $0x30] sm:$0xff]  ;;  %v310_v13 = vld [vmem:[%s2984_s20 + $0x38] sm:$0xff]  ;;  %v311_v15 = vld [vmem:[%s2984_s20 + $0x40] sm:$0xff]  ;;  %1047 = vmatpush.bf16.msra.mxu1 %v2444_v25  ;;  %2452 = vmatpush.bf16.msra.mxu2 %v2444_v25 }
  0x1a   : > { %v370_v14 = vpack.c.bf16 %v310_v13, %v309_v12  ;;  %v312_v16 = vld [vmem:[%s2984_s20 + $0x48] sm:$0xff]  ;;  %v313_v18 = vld [vmem:[%s2984_s20 + $0x50] sm:$0xff]  ;;  %v314_v19 = vld [vmem:[%s2984_s20 + $0x58] sm:$0xff] }
  0x1b   : > { %2343 = vmatmul.msk.bf16.vlgmr.msra.gmra.mxu0 %vm419_vm0, %v367_v5  ;;  %v371_v17 = vpack.c.bf16 %v312_v16, %v311_v15  ;;  %v372_v20 = vpack.c.bf16 %v314_v19, %v313_v18  ;;  %v315_v21 = vld [vmem:[%s2984_s20 + $0x60] sm:$0xff]  ;;  %v316_v22 = vld [vmem:[%s2984_s20 + $0x68] sm:$0xff]  ;;  %v317_v28 = vld [vmem:[%s2984_s20 + $0x70] sm:$0xff] }
  0x1c   : > { %v373_v23 = vpack.c.bf16 %v316_v22, %v315_v21  ;;  %v318_v29 = vld [vmem:[%s2984_s20 + $0x78] sm:$0xff]  ;;  %v319_v31 = vld [vmem:[%s2984_s20 + $0x80] sm:$0xff]  ;;  %v320_v32 = vld [vmem:[%s2984_s20 + $0x88] sm:$0xff] }
  0x1d   : > { %1048 = vmatpush.bf16.msra.mxu1 %v2443_v26  ;;  %2453 = vmatpush.bf16.msra.mxu2 %v2443_v26  ;;  %v374_v30 = vpack.c.bf16 %v318_v29, %v317_v28  ;;  %v375_v33 = vpack.c.bf16 %v320_v32, %v319_v31  ;;  %v321_v41 = vld [vmem:[%s2984_s20 + $0x90] sm:$0xff]  ;;  %v322_v42 = vld [vmem:[%s2984_s20 + $0x98] sm:$0xff]  ;;  %v323_v53 = vld [vmem:[%s2984_s20 + $0xa0] sm:$0xff] }
  0x1e   : > { %v376_v46 = vpack.c.bf16 %v322_v42, %v321_v41  ;;  %v324_v54 = vld [vmem:[%s2984_s20 + $0xa8] sm:$0xff]  ;;  %v325_v1 = vld [vmem:[%s2984_s20 + $0xb0] sm:$0xff]  ;;  %v326_v2 = vld [vmem:[%s2984_s20 + $0xb8] sm:$0xff] }
  0x1f   : > { %v377_v58 = vpack.c.bf16 %v324_v54, %v323_v53  ;;  %v378_v6 = vpack.c.bf16 %v326_v2, %v325_v1  ;;  %v327_v13 = vld [vmem:[%s2984_s20 + $0xc0] sm:$0xff]  ;;  %v329_v25 = vld [vmem:[%s2984_s20 + $0xd0] sm:$0xff]  ;;  %v330_v26 = vld [vmem:[%s2984_s20 + $0xd8] sm:$0xff] }
  0x20   : > { %v333_v53 = vld [vmem:[%s2984_s20 + $0xf0] sm:$0xff]  ;;  %v334_v54 = vld [vmem:[%s2984_s20 + $0xf8] sm:$0xff] }
  0x21   : > { %1049 = vmatpush.bf16.msra.mxu1 %v2442_v27  ;;  %2454 = vmatpush.bf16.msra.mxu2 %v2442_v27 }
  0x2b   : > { %2344 = vmatmul.msk.bf16.gmra.mxu0 %vm419_vm0, %v368_v8 }
  0x3b   : > { %2345 = vmatmul.msk.bf16.gmra.mxu0 %vm419_vm0, %v369_v11 }
  0x4b   : > { %2346 = vmatmul.msk.bf16.gmra.mxu0 %vm419_vm0, %v370_v14  ;;  %v328_v14 = vld [vmem:[%s2984_s20 + $0xc8] sm:$0xff] }
  0x4c   : > { %v379_v18 = vpack.c.bf16 %v328_v14, %v327_v13 }
  0x5b   : > { %2347 = vmatmul.msk.bf16.gmra.mxu0 %vm419_vm0, %v371_v17 }
  0x6b   : > { %2348 = vmatmul.msk.bf16.gmra.mxu0 %vm419_vm0, %v372_v20 }
  0x7b   : > { %2349 = vmatmul.msk.bf16.gmra.mxu0 %vm419_vm0, %v373_v23 }
  0x8b   : > { %2350 = vmatmul.msk.bf16.gmra.mxu0 %vm419_vm0, %v374_v30  ;;  %v380_v30 = vpack.c.bf16 %v330_v26, %v329_v25  ;;  %v3098_v25 = vld [vmem:[%s3833_s5] ss:$0 sm:$0xff] }
  0x98   : > { %v525_v34 = vpop.f32.mrf.mxu0 }
  0x99   : > { %v526_v36 = vadd.f32 %v3027_v35, %v525_v34 }
  0x9b   : > { %2351 = vmatmul.msk.bf16.gmra.mxu0 %vm419_vm0, %v375_v33  ;;  %v749_v38 = vmul.f32 0.01, %v526_v36  ;;  %vm685_vm1 = vcmp.gt.f32.partialorder %v526_v36, 0.0 }
  0x9d   : > { %v813_v43 = vsel %vm685_vm1, %v526_v36, %v749_v38  ;;  %v331_v38 = vld [vmem:[%s2984_s20 + $0xe0] sm:$0xff] }
  0xa0   : > { %v527_v37 = vpop.f32.mrf.mxu0 }
  0xa1   : > { %v528_v39 = vadd.f32 %v3027_v35, %v527_v37 }
  0xa3   : > { %vm686_vm2 = vcmp.gt.f32.partialorder %v528_v39, 0.0  ;;  %v750_v40 = vmul.f32 0.01, %v528_v39 }
  0xa5   : > { %v814_v44 = vsel %vm686_vm2, %v528_v39, %v750_v40  ;;  %v332_v39 = vld [vmem:[%s2984_s20 + $0xe8] sm:$0xff] }
  0xa6   : > { %v877_v45 = vpack.c.bf16 %v814_v44, %v813_v43  ;;  %v381_v43 = vpack.c.bf16 %v332_v39, %v331_v38 }
  0xa8   : > { %v530_v47 = vpop.f32.mrf.mxu0  ;;  %2391 = vmatmul.msk.bf16.vlgmr.msra.gmra.mxu1 %vm945_vm3, %v877_v45  ;;  %v337_v45 = vld [vmem:[%s2984_s20 + $0x110] sm:$0xff] }
  0xa9   : > { %v531_v48 = vadd.f32 %v3027_v35, %v530_v47 }
  0xab   : > { %2352 = vmatmul.msk.bf16.gmra.mxu0 %vm419_vm0, %v376_v46  ;;  %v751_v50 = vmul.f32 0.01, %v531_v48  ;;  %vm687_vm4 = vcmp.gt.f32.partialorder %v531_v48, 0.0  ;;  %v338_v46 = vld [vmem:[%s2984_s20 + $0x118] sm:$0xff] }
  0xac   : > { %v384_v47 = vpack.c.bf16 %v338_v46, %v337_v45 }
  0xad   : > { %v815_v55 = vsel %vm687_vm4, %v531_v48, %v751_v50 }
  0xae   : > { %2360 = vmatmul.msk.bf16.vlgmr.msra.gmra.mxu3 %vm419_vm0, %v384_v47 }
  0xb0   : > { %v532_v49 = vpop.f32.mrf.mxu0 }
  0xb1   : > { %v533_v51 = vadd.f32 %v3027_v35, %v532_v49 }
  0xb3   : > { %vm688_vm5 = vcmp.gt.f32.partialorder %v533_v51, 0.0  ;;  %v752_v52 = vmul.f32 0.01, %v533_v51 }
  0xb5   : > { %v816_v56 = vsel %vm688_vm5, %v533_v51, %v752_v52 }
  0xb6   : > { %v878_v57 = vpack.c.bf16 %v816_v56, %v815_v55 }
  0xb8   : > { %v535_v59 = vpop.f32.mrf.mxu0  ;;  %2392 = vmatmul.msk.bf16.gmra.mxu1 %vm945_vm3, %v878_v57 }
  0xb9   : > { %v536_v60 = vadd.f32 %v3027_v35, %v535_v59 }
  0xbb   : > { %2353 = vmatmul.msk.bf16.gmra.mxu0 %vm419_vm0, %v377_v58  ;;  %v753_v62 = vmul.f32 0.01, %v536_v60  ;;  %vm689_vm6 = vcmp.gt.f32.partialorder %v536_v60, 0.0  ;;  %v382_v58 = vpack.c.bf16 %v334_v54, %v333_v53 }
  0xbd   : > { %v817_v3 = vsel %vm689_vm6, %v536_v60, %v753_v62  ;;  %v339_v60 = vld [vmem:[%s2984_s20 + $0x120] sm:$0xff] }
  0xc0   : > { %v537_v61 = vpop.f32.mrf.mxu0 }
  0xc1   : > { %v538_v63 = vadd.f32 %v3027_v35, %v537_v61  ;;  %v340_v61 = vld [vmem:[%s2984_s20 + $0x128] sm:$0xff] }
  0xc2   : > { %v385_v62 = vpack.c.bf16 %v340_v61, %v339_v60 }
  0xc3   : > { %vm690_vm7 = vcmp.gt.f32.partialorder %v538_v63, 0.0  ;;  %v754_v0 = vmul.f32 0.01, %v538_v63 }
  0xc4   : > { %2361 = vmatmul.msk.bf16.gmra.mxu3 %vm419_vm0, %v385_v62 }
  0xc5   : > { %v818_v4 = vsel %vm690_vm7, %v538_v63, %v754_v0 }
  0xc6   : > { %v879_v5 = vpack.c.bf16 %v818_v4, %v817_v3  ;;  %v335_v4 = vld [vmem:[%s2984_s20 + $0x100] sm:$0xff] }
  0xc8   : > { %v540_v7 = vpop.f32.mrf.mxu0  ;;  %2393 = vmatmul.msk.bf16.gmra.mxu1 %vm945_vm3, %v879_v5  ;;  %v336_v5 = vld [vmem:[%s2984_s20 + $0x108] sm:$0xff] }
  0xc9   : > { %v541_v8 = vadd.f32 %v3027_v35, %v540_v7 }
  0xcb   : > { %2354 = vmatmul.msk.bf16.gmra.mxu0 %vm419_vm0, %v378_v6  ;;  %v755_v10 = vmul.f32 0.01, %v541_v8  ;;  %vm691_vm8 = vcmp.gt.f32.partialorder %v541_v8, 0.0 }
  0xcd   : > { %v819_v15 = vsel %vm691_vm8, %v541_v8, %v755_v10 }
  0xd0   : > { %v542_v9 = vpop.f32.mrf.mxu0 }
  0xd1   : > { %v543_v11 = vadd.f32 %v3027_v35, %v542_v9  ;;  %v383_v9 = vpack.c.bf16 %v336_v5, %v335_v4 }
  0xd3   : > { %vm692_vm9 = vcmp.gt.f32.partialorder %v543_v11, 0.0  ;;  %v756_v12 = vmul.f32 0.01, %v543_v11 }
  0xd5   : > { %v820_v16 = vsel %vm692_vm9, %v543_v11, %v756_v12  ;;  %v341_v11 = vld [vmem:[%s2984_s20 + $0x130] sm:$0xff]  ;;  %v342_v12 = vld [vmem:[%s2984_s20 + $0x138] sm:$0xff] }
  0xd6   : > { %v880_v17 = vpack.c.bf16 %v820_v16, %v819_v15  ;;  %v386_v13 = vpack.c.bf16 %v342_v12, %v341_v11 }
  0xd8   : > { %v545_v19 = vpop.f32.mrf.mxu0  ;;  %2394 = vmatmul.msk.bf16.gmra.mxu1 %vm945_vm3, %v880_v17  ;;  %2362 = vmatmul.msk.bf16.gmra.mxu3 %vm419_vm0, %v386_v13 }
  0xd9   : > { %v546_v20 = vadd.f32 %v3027_v35, %v545_v19 }
  0xdb   : > { %2355 = vmatmul.msk.bf16.gmra.mxu0 %vm419_vm0, %v379_v18  ;;  %v757_v22 = vmul.f32 0.01, %v546_v20  ;;  %vm693_vm10 = vcmp.gt.f32.partialorder %v546_v20, 0.0  ;;  %v3092_v18 = vld [vmem:[%s3832_s4] ss:$0 sm:$0xff] }
  0xdd   : > { %v821_v27 = vsel %vm693_vm10, %v546_v20, %v757_v22 }
  0xe0   : > { %v547_v21 = vpop.f32.mrf.mxu0 }
  0xe1   : > { %v548_v23 = vadd.f32 %v3027_v35, %v547_v21 }
  0xe3   : > { %vm694_vm11 = vcmp.gt.f32.partialorder %v548_v23, 0.0  ;;  %v758_v24 = vmul.f32 0.01, %v548_v23 }
  0xe5   : > { %v822_v28 = vsel %vm694_vm11, %v548_v23, %v758_v24 }
  0xe6   : > { %v881_v29 = vpack.c.bf16 %v822_v28, %v821_v27  ;;  %v343_v28 = vld [vmem:[%s2984_s20 + $0x140] sm:$0xff] }
  0xe8   : > { %v550_v31 = vpop.f32.mrf.mxu0  ;;  %2395 = vmatmul.msk.bf16.gmra.mxu1 %vm945_vm3, %v881_v29  ;;  %v344_v29 = vld [vmem:[%s2984_s20 + $0x148] sm:$0xff] }
  0xe9   : > { %v551_v32 = vadd.f32 %v3027_v35, %v550_v31 }
  0xeb   : > { %2356 = vmatmul.msk.bf16.gmra.mxu0 %vm419_vm0, %v380_v30  ;;  %v759_v34 = vmul.f32 0.01, %v551_v32  ;;  %vm695_vm12 = vcmp.gt.f32.partialorder %v551_v32, 0.0  ;;  %v387_v30 = vpack.c.bf16 %v344_v29, %v343_v28 }
  0xed   : > { %v823_v40 = vsel %vm695_vm12, %v551_v32, %v759_v34  ;;  %2363 = vmatmul.msk.bf16.gmra.mxu3 %vm419_vm0, %v387_v30 }
  0xf0   : > { %v552_v33 = vpop.f32.mrf.mxu0 }
  0xf1   : > { %v553_v36 = vadd.f32 %v3027_v35, %v552_v33 }
  0xf3   : > { %vm696_vm13 = vcmp.gt.f32.partialorder %v553_v36, 0.0  ;;  %v760_v37 = vmul.f32 0.01, %v553_v36 }
  0xf5   : > { %v824_v41 = vsel %vm696_vm13, %v553_v36, %v760_v37 }
  0xf6   : > { %v882_v42 = vpack.c.bf16 %v824_v41, %v823_v40 }
  0xf8   : > { %v555_v44 = vpop.f32.mrf.mxu0  ;;  %2396 = vmatmul.msk.bf16.gmra.mxu1 %vm945_vm3, %v882_v42 }
  0xf9   : > { %v556_v48 = vadd.f32 %v3027_v35, %v555_v44 }
  0xfb   : > { %2357 = vmatmul.msk.bf16.gmra.mxu0 %vm419_vm0, %v381_v43  ;;  %v761_v50 = vmul.f32 0.01, %v556_v48  ;;  %vm697_vm14 = vcmp.gt.f32.partialorder %v556_v48, 0.0 }
  0xfd   : > { %v825_v55 = vsel %vm697_vm14, %v556_v48, %v761_v50 }
 0x100   : > { %v557_v49 = vpop.f32.mrf.mxu0 }
 0x101   : > { %v558_v51 = vadd.f32 %v3027_v35, %v557_v49 }
 0x103   : > { %vm698_vm15 = vcmp.gt.f32.partialorder %v558_v51, 0.0  ;;  %v762_v52 = vmul.f32 0.01, %v558_v51 }
 0x105   : > { %v826_v56 = vsel %vm698_vm15, %v558_v51, %v762_v52  ;;  %v345_v51 = vld [vmem:[%s2984_s20 + $0x150] sm:$0xff]  ;;  %v346_v52 = vld [vmem:[%s2984_s20 + $0x158] sm:$0xff] }
 0x106   : > { %v883_v57 = vpack.c.bf16 %v826_v56, %v825_v55  ;;  %v388_v53 = vpack.c.bf16 %v346_v52, %v345_v51 }
 0x108   : > { %v560_v59 = vpop.f32.mrf.mxu0  ;;  %2397 = vmatmul.msk.bf16.gmra.mxu1 %vm945_vm3, %v883_v57  ;;  %2364 = vmatmul.msk.bf16.gmra.mxu3 %vm419_vm0, %v388_v53 }
 0x109   : > { %v561_v63 = vadd.f32 %v3027_v35, %v560_v59 }
 0x10b   : > { %2358 = vmatmul.msk.bf16.gmra.mxu0 %vm419_vm0, %v382_v58  ;;  %v763_v1 = vmul.f32 0.01, %v561_v63  ;;  %vm699_vm1 = vcmp.gt.f32.partialorder %v561_v63, 0.0 }
 0x10d   : > { %v827_v6 = vsel %vm699_vm1, %v561_v63, %v763_v1 }
 0x110   : > { %v562_v0 = vpop.f32.mrf.mxu0 }
 0x111   : > { %v563_v2 = vadd.f32 %v3027_v35, %v562_v0 }
 0x113   : > { %vm700_vm2 = vcmp.gt.f32.partialorder %v563_v2, 0.0  ;;  %v764_v3 = vmul.f32 0.01, %v563_v2 }
 0x115   : > { %v828_v7 = vsel %vm700_vm2, %v563_v2, %v764_v3 }
 0x116   : > { %v884_v8 = vpack.c.bf16 %v828_v7, %v827_v6 }
 0x118   : > { %v565_v10 = vpop.f32.mrf.mxu0  ;;  %2398 = vmatmul.msk.bf16.gmra.mxu1 %vm945_vm3, %v884_v8 }
 0x119   : > { %v566_v14 = vadd.f32 %v3027_v35, %v565_v10  ;;  %v348_v10 = vld [vmem:[%s2984_s20 + $0x168] sm:$0xff] }
 0x11b   : > { %2359 = vmatmul.msk.bf16.gmra.mxu0 %vm419_vm0, %v383_v9  ;;  %v765_v16 = vmul.f32 0.01, %v566_v14  ;;  %vm701_vm4 = vcmp.gt.f32.partialorder %v566_v14, 0.0  ;;  %v347_v9 = vld [vmem:[%s2984_s20 + $0x160] sm:$0xff] }
 0x11c   : > { %v389_v11 = vpack.c.bf16 %v348_v10, %v347_v9 }
 0x11d   : > { %v829_v21 = vsel %vm701_vm4, %v566_v14, %v765_v16 }
 0x11e   : > { %2365 = vmatmul.msk.bf16.gmra.mxu3 %vm419_vm0, %v389_v11 }
 0x120   : > { %v567_v15 = vpop.f32.mrf.mxu0 }
 0x121   : > { %v568_v17 = vadd.f32 %v3027_v35, %v567_v15 }
 0x123   : > { %vm702_vm5 = vcmp.gt.f32.partialorder %v568_v17, 0.0  ;;  %v766_v19 = vmul.f32 0.01, %v568_v17 }
 0x125   : > { %v1051_v20 = vpop.f32.mrf.mxu1  ;;  %v830_v22 = vsel %vm702_vm5, %v568_v17, %v766_v19 }
 0x126   : > { %v1052_v23 = vadd.f32 %v3092_v18, %v1051_v20  ;;  %v885_v24 = vpack.c.bf16 %v830_v22, %v829_v21 }
 0x128   : > { %v1211_v26 = vmax.f32 %v1052_v23, 0.0  ;;  %v570_v27 = vpop.f32.mrf.mxu0  ;;  %2399 = vmatmul.msk.bf16.gmra.mxu1 %vm945_vm3, %v885_v24 }
 0x129   : > { %v571_v33 = vadd.f32 %v3027_v35, %v570_v27 }
 0x12a   : > { %v1279_v31 = vmul.f32 %v3098_v25, %v1211_v26 }
 0x12b   : > { %v767_v39 = vmul.f32 0.01, %v571_v33  ;;  %vm703_vm6 = vcmp.gt.f32.partialorder %v571_v33, 0.0 }
 0x12c   : > { %v1343_v32 = vsel %vm419_vm0, %v1279_v31, 0.0 }
 0x12d   : > { %v1053_v34 = vpop.f32.mrf.mxu1  ;;  %1344 = vadd.xlane.f32.xlu0 %v1343_v32  ;;  %v831_v45 = vsel %vm703_vm6, %v571_v33, %v767_v39  ;;  %v349_v33 = vld [vmem:[%s2984_s20 + $0x170] sm:$0xff] }
 0x12e   : > { %v1054_v36 = vadd.f32 %v3092_v18, %v1053_v34  ;;  %v350_v34 = vld [vmem:[%s2984_s20 + $0x178] sm:$0xff] }
 0x130   : > { %v1212_v37 = vmax.f32 %v1054_v36, 0.0  ;;  %v572_v38 = vpop.f32.mrf.mxu0  ;;  %v390_v36 = vpack.c.bf16 %v350_v34, %v349_v33 }
 0x131   : > { %v573_v40 = vadd.f32 %v3027_v35, %v572_v38 }
 0x132   : > { %v1280_v41 = vmul.f32 %v3098_v25, %v1212_v37  ;;  %2366 = vmatmul.msk.bf16.gmra.mxu3 %vm419_vm0, %v390_v36 }
 0x133   : > { %vm704_vm7 = vcmp.gt.f32.partialorder %v573_v40, 0.0  ;;  %v768_v42 = vmul.f32 0.01, %v573_v40 }
 0x134   : > { %v1346_v43 = vsel %vm419_vm0, %v1280_v41, 0.0 }
 0x135   : > { %v1056_v44 = vpop.f32.mrf.mxu1  ;;  %1347 = vadd.xlane.f32.xlu0 %v1346_v43  ;;  %v832_v46 = vsel %vm704_vm7, %v573_v40, %v768_v42 }
 0x136   : > { %v1057_v47 = vadd.f32 %v3092_v18, %v1056_v44  ;;  %v886_v48 = vpack.c.bf16 %v832_v46, %v831_v45 }
 0x138   : > { %v1213_v49 = vmax.f32 %v1057_v47, 0.0  ;;  %v575_v50 = vpop.f32.mrf.mxu0  ;;  %2400 = vmatmul.msk.bf16.gmra.mxu1 %vm945_vm3, %v886_v48 }
 0x139   : > { %v576_v56 = vadd.f32 %v3027_v35, %v575_v50 }
 0x13a   : > { %v1281_v54 = vmul.f32 %v3098_v25, %v1213_v49 }
 0x13b   : > { %v769_v61 = vmul.f32 0.01, %v576_v56  ;;  %vm705_vm8 = vcmp.gt.f32.partialorder %v576_v56, 0.0 }
 0x13c   : > { %v1349_v55 = vsel %vm419_vm0, %v1281_v54, 0.0 }
 0x13d   : > { %v1058_v57 = vpop.f32.mrf.mxu1  ;;  %1350 = vadd.xlane.f32.xlu1 %v1349_v55  ;;  %v833_v3 = vsel %vm705_vm8, %v576_v56, %v769_v61  ;;  %v351_v56 = vld [vmem:[%s2984_s20 + $0x180] sm:$0xff] }
 0x13e   : > { %v1059_v58 = vadd.f32 %v3092_v18, %v1058_v57  ;;  %v352_v57 = vld [vmem:[%s2984_s20 + $0x188] sm:$0xff] }
 0x140   : > { %v1214_v59 = vmax.f32 %v1059_v58, 0.0  ;;  %v577_v60 = vpop.f32.mrf.mxu0  ;;  %v391_v58 = vpack.c.bf16 %v352_v57, %v351_v56 }
 0x141   : > { %v578_v62 = vadd.f32 %v3027_v35, %v577_v60 }
 0x142   : > { %v1282_v63 = vmul.f32 %v3098_v25, %v1214_v59  ;;  %2367 = vmatmul.msk.bf16.gmra.mxu3 %vm419_vm0, %v391_v58 }
 0x143   : > { %vm706_vm9 = vcmp.gt.f32.partialorder %v578_v62, 0.0  ;;  %v770_v0 = vmul.f32 0.01, %v578_v62 }
 0x144   : > { %v1352_v1 = vsel %vm419_vm0, %v1282_v63, 0.0 }
 0x145   : > { %v1061_v2 = vpop.f32.mrf.mxu1  ;;  %1353 = vadd.xlane.f32.xlu1 %v1352_v1  ;;  %v834_v4 = vsel %vm706_vm9, %v578_v62, %v770_v0 }
 0x146   : > { %v1062_v5 = vadd.f32 %v3092_v18, %v1061_v2  ;;  %v887_v6 = vpack.c.bf16 %v834_v4, %v833_v3 }
 0x148   : > { %v1215_v7 = vmax.f32 %v1062_v5, 0.0  ;;  %v580_v8 = vpop.f32.mrf.mxu0  ;;  %2401 = vmatmul.msk.bf16.gmra.mxu1 %vm945_vm3, %v887_v6 }
 0x149   : > { %v581_v14 = vadd.f32 %v3027_v35, %v580_v8 }
 0x14a   : > { %v1283_v12 = vmul.f32 %v3098_v25, %v1215_v7 }
 0x14b   : > { %v771_v20 = vmul.f32 0.01, %v581_v14  ;;  %vm707_vm10 = vcmp.gt.f32.partialorder %v581_v14, 0.0 }
 0x14c   : > { %v1355_v13 = vsel %vm419_vm0, %v1283_v12, 0.0 }
 0x14d   : > { %v1063_v15 = vpop.f32.mrf.mxu1  ;;  %1356 = vadd.xlane.f32.xlu2 %v1355_v13  ;;  %v835_v27 = vsel %vm707_vm10, %v581_v14, %v771_v20  ;;  %v353_v14 = vld [vmem:[%s2984_s20 + $0x190] sm:$0xff]  ;;  %vm1923_vm10 = vcmask 7168  }
 0x14e   : > { %v1064_v16 = vadd.f32 %v3092_v18, %v1063_v15  ;;  %v354_v15 = vld [vmem:[%s2984_s20 + $0x198] sm:$0xff] }
 0x150   : > { %v1216_v17 = vmax.f32 %v1064_v16, 0.0  ;;  %v582_v19 = vpop.f32.mrf.mxu0  ;;  %v392_v16 = vpack.c.bf16 %v354_v15, %v353_v14 }
 0x151   : > { %v583_v21 = vadd.f32 %v3027_v35, %v582_v19 }
 0x152   : > { %v1284_v22 = vmul.f32 %v3098_v25, %v1216_v17  ;;  %2368 = vmatmul.msk.bf16.gmra.mxu3 %vm419_vm0, %v392_v16 }
 0x153   : > { %vm708_vm11 = vcmp.gt.f32.partialorder %v583_v21, 0.0  ;;  %v772_v23 = vmul.f32 0.01, %v583_v21 }
 0x154   : > { %v1358_v24 = vsel %vm419_vm0, %v1284_v22, 0.0 }
 0x155   : > { %v1066_v26 = vpop.f32.mrf.mxu1  ;;  %1359 = vadd.xlane.f32.xlu2 %v1358_v24  ;;  %v836_v28 = vsel %vm708_vm11, %v583_v21, %v772_v23  ;;  %v3168_v23 = vpop.f32.mrf.mxu3 }
 0x156   : > { %v1067_v29 = vadd.f32 %v3092_v18, %v1066_v26  ;;  %v888_v30 = vpack.c.bf16 %v836_v28, %v835_v27 }
 0x158   : > { %v1217_v31 = vmax.f32 %v1067_v29, 0.0  ;;  %v585_v32 = vpop.f32.mrf.mxu0  ;;  %2402 = vmatmul.msk.bf16.gmra.mxu1 %vm945_vm3, %v888_v30 }
 0x159   : > { %v586_v39 = vadd.f32 %v3027_v35, %v585_v32 }
 0x15a   : > { %v1285_v37 = vmul.f32 %v3098_v25, %v1217_v31 }
 0x15b   : > { %v773_v44 = vmul.f32 0.01, %v586_v39  ;;  %vm709_vm12 = vcmp.gt.f32.partialorder %v586_v39, 0.0 }
 0x15c   : > { %v1361_v38 = vsel %vm419_vm0, %v1285_v37, 0.0 }
 0x15d   : > { %v1068_v40 = vpop.f32.mrf.mxu1  ;;  %1362 = vadd.xlane.f32.xlu0 %v1361_v38  ;;  %v837_v49 = vsel %vm709_vm12, %v586_v39, %v773_v44  ;;  %v3174_v38 = vpop.f32.mrf.mxu3 }
 0x15e   : > { %v1069_v41 = vadd.f32 %v3092_v18, %v1068_v40 }
 0x160   : > { %v1218_v42 = vmax.f32 %v1069_v41, 0.0  ;;  %v587_v43 = vpop.f32.mrf.mxu0  ;;  %v355_v41 = vld [vmem:[%s2984_s20 + $0x1a0] sm:$0xff] }
 0x161   : > { %v588_v45 = vadd.f32 %v3027_v35, %v587_v43 }
 0x162   : > { %v1286_v46 = vmul.f32 %v3098_v25, %v1218_v42  ;;  %v356_v42 = vld [vmem:[%s2984_s20 + $0x1a8] sm:$0xff] }
 0x163   : > { %vm710_vm13 = vcmp.gt.f32.partialorder %v588_v45, 0.0  ;;  %v774_v47 = vmul.f32 0.01, %v588_v45  ;;  %v393_v43 = vpack.c.bf16 %v356_v42, %v355_v41  ;;  %v613_v41 = vadd.f32 %v3027_v35, %v3174_v38 }
 0x164   : > { %v1364_v48 = vsel %vm419_vm0, %v1286_v46, 0.0 }
 0x165   : > { %v838_v50 = vsel %vm710_vm13, %v588_v45, %v774_v47  ;;  %v1071_v51 = vpop.f32.mrf.mxu1  ;;  %1365 = vadd.xlane.f32.xlu1 %v1364_v48  ;;  %2369 = vmatmul.msk.bf16.gmra.mxu3 %vm419_vm0, %v393_v43  ;;  %vm720_vm9 = vcmp.gt.f32.partialorder %v613_v41, 0.0 }
 0x166   : > { %v889_v52 = vpack.c.bf16 %v838_v50, %v837_v49  ;;  %v1072_v53 = vadd.f32 %v3092_v18, %v1071_v51  ;;  %v3184_v49 = vpop.f32.mrf.mxu3 }
 0x168   : > { %v1219_v54 = vmax.f32 %v1072_v53, 0.0  ;;  %v590_v55 = vpop.f32.mrf.mxu0  ;;  %2403 = vmatmul.msk.bf16.gmra.mxu1 %vm945_vm3, %v889_v52 }
 0x169   : > { %v591_v61 = vadd.f32 %v3027_v35, %v590_v55 }
 0x16a   : > { %v1287_v59 = vmul.f32 %v3098_v25, %v1219_v54 }
 0x16b   : > { %v775_v2 = vmul.f32 0.01, %v591_v61  ;;  %vm711_vm14 = vcmp.gt.f32.partialorder %v591_v61, 0.0 }
 0x16c   : > { %v1367_v60 = vsel %vm419_vm0, %v1287_v59, 0.0 }
 0x16d   : > { %v1073_v62 = vpop.f32.mrf.mxu1  ;;  %1368 = vadd.xlane.f32.xlu2 %v1367_v60  ;;  %v839_v7 = vsel %vm711_vm14, %v591_v61, %v775_v2  ;;  %v358_v2 = vld [vmem:[%s2984_s20 + $0x1b8] sm:$0xff] }
 0x16e   : > { %v1074_v63 = vadd.f32 %v3092_v18, %v1073_v62  ;;  %v3190_v62 = vpop.f32.mrf.mxu3 }
 0x170   : > { %v1220_v0 = vmax.f32 %v1074_v63, 0.0  ;;  %v592_v1 = vpop.f32.mrf.mxu0 }
 0x171   : > { %v593_v3 = vadd.f32 %v3027_v35, %v592_v1  ;;  %v357_v1 = vld [vmem:[%s2984_s20 + $0x1b0] sm:$0xff] }
 0x172   : > { %v1288_v4 = vmul.f32 %v3098_v25, %v1220_v0 }
 0x173   : > { %vm712_vm15 = vcmp.gt.f32.partialorder %v593_v3, 0.0  ;;  %v776_v5 = vmul.f32 0.01, %v593_v3 }
 0x174   : > { %v1370_v6 = vsel %vm419_vm0, %v1288_v4, 0.0 }
 0x175   : > { %v840_v8 = vsel %vm712_vm15, %v593_v3, %v776_v5  ;;  %v1076_v9 = vpop.f32.mrf.mxu1  ;;  %1371 = vadd.xlane.f32.xlu0 %v1370_v6  ;;  %v394_v3 = vpack.c.bf16 %v358_v2, %v357_v1 }
 0x176   : > { %v890_v10 = vpack.c.bf16 %v840_v8, %v839_v7  ;;  %v1077_v11 = vadd.f32 %v3092_v18, %v1076_v9  ;;  %v3199_v8 = vld [vmem:[#allocation2] ss:$0 sm:$0xff] }
 0x177   : > { %2370 = vmatmul.msk.bf16.gmra.mxu3 %vm419_vm0, %v394_v3 }
 0x178   : > { %v1221_v12 = vmax.f32 %v1077_v11, 0.0  ;;  %v595_v13 = vpop.f32.mrf.mxu0  ;;  %2404 = vmatmul.msk.bf16.gmra.mxu1 %vm945_vm3, %v890_v10  ;;  %v3202_v10 = vpop.f32.mrf.mxu3 }
 0x179   : > { %v596_v20 = vadd.f32 %v3027_v35, %v595_v13 }
 0x17a   : > { %v1289_v17 = vmul.f32 %v3098_v25, %v1221_v12 }
 0x17b   : > { %v777_v27 = vmul.f32 0.01, %v596_v20  ;;  %vm713_vm1 = vcmp.gt.f32.partialorder %v596_v20, 0.0 }
 0x17c   : > { %v1373_v19 = vsel %vm419_vm0, %v1289_v17, 0.0 }
 0x17d   : > { %v1078_v21 = vpop.f32.mrf.mxu1  ;;  %1374 = vadd.xlane.f32.xlu1 %v1373_v19  ;;  %v841_v32 = vsel %vm713_vm1, %v596_v20, %v777_v27 }
 0x17e   : > { %v1079_v22 = vadd.f32 %v3092_v18, %v1078_v21 }
 0x180   : > { %v1222_v24 = vmax.f32 %v1079_v22, 0.0  ;;  %v597_v26 = vpop.f32.mrf.mxu0 }
 0x181   : > { %v598_v28 = vadd.f32 %v3027_v35, %v597_v26 }
 0x182   : > { %v1290_v29 = vmul.f32 %v3098_v25, %v1222_v24 }
 0x183   : > { %vm714_vm2 = vcmp.gt.f32.partialorder %v598_v28, 0.0  ;;  %v778_v30 = vmul.f32 0.01, %v598_v28 }
 0x184   : > { %v1376_v31 = vsel %vm419_vm0, %v1290_v29, 0.0 }
 0x185   : > { %v842_v33 = vsel %vm714_vm2, %v598_v28, %v778_v30  ;;  %v1081_v34 = vpop.f32.mrf.mxu1  ;;  %1377 = vadd.xlane.f32.xlu2 %v1376_v31  ;;  %v3209_v30 = vpop.f32.mrf.mxu3 }
 0x186   : > { %v891_v36 = vpack.c.bf16 %v842_v33, %v841_v32  ;;  %v1082_v37 = vadd.f32 %v3092_v18, %v1081_v34  ;;  %v359_v33 = vld [vmem:[%s2984_s20 + $0x1c0] sm:$0xff]  ;;  %v360_v34 = vld [vmem:[%s2984_s20 + $0x1c8] sm:$0xff] }
 0x188   : > { %v1223_v39 = vmax.f32 %v1082_v37, 0.0  ;;  %v600_v40 = vpop.f32.mrf.mxu0  ;;  %2405 = vmatmul.msk.bf16.gmra.mxu1 %vm945_vm3, %v891_v36  ;;  %v395_v37 = vpack.c.bf16 %v360_v34, %v359_v33 }
 0x189   : > { %v601_v46 = vadd.f32 %v3027_v35, %v600_v40  ;;  %v611_v40 = vadd.f32 %v3027_v35, %v3168_v23 }
 0x18a   : > { %v1291_v44 = vmul.f32 %v3098_v25, %v1223_v39  ;;  %2371 = vmatmul.msk.bf16.gmra.mxu3 %vm419_vm0, %v395_v37 }
 0x18b   : > { %v779_v52 = vmul.f32 0.01, %v601_v46  ;;  %vm715_vm4 = vcmp.gt.f32.partialorder %v601_v46, 0.0  ;;  %vm719_vm8 = vcmp.gt.f32.partialorder %v611_v40, 0.0 }
 0x18c   : > { %v1379_v45 = vsel %vm419_vm0, %v1291_v44, 0.0 }
 0x18d   : > { %v1083_v47 = vpop.f32.mrf.mxu1  ;;  %1380 = vadd.xlane.f32.xlu0 %v1379_v45  ;;  %v843_v57 = vsel %vm715_vm4, %v601_v46, %v779_v52  ;;  %v3224_v23 = vpop.f32.mrf.mxu3 }
 0x18e   : > { %v1084_v48 = vadd.f32 %v3092_v18, %v1083_v47 }
 0x190   : > { %v1224_v50 = vmax.f32 %v1084_v48, 0.0  ;;  %v602_v51 = vpop.f32.mrf.mxu0 }
 0x191   : > { %v603_v53 = vadd.f32 %v3027_v35, %v602_v51  ;;  %v784_v51 = vmul.f32 0.01, %v613_v41 }
 0x192   : > { %v1292_v54 = vmul.f32 %v3098_v25, %v1224_v50  ;;  %v783_v50 = vmul.f32 0.01, %v611_v40 }
 0x193   : > { %vm716_vm5 = vcmp.gt.f32.partialorder %v603_v53, 0.0  ;;  %v780_v55 = vmul.f32 0.01, %v603_v53 }
 0x194   : > { %v1382_v56 = vsel %vm419_vm0, %v1292_v54, 0.0 }
 0x195   : > { %v844_v58 = vsel %vm716_vm5, %v603_v53, %v780_v55  ;;  %v1086_v59 = vpop.f32.mrf.mxu1  ;;  %1383 = vadd.xlane.f32.xlu1 %v1382_v56  ;;  %v847_v56 = vsel %vm719_vm8, %v611_v40, %v783_v50  ;;  %v3234_v3 = vpop.f32.mrf.mxu3  ;;  %v364_v50 = vld [vmem:[%s2984_s20 + $0x1e8] sm:$0xff] }
 0x196   : > { %v892_v60 = vpack.c.bf16 %v844_v58, %v843_v57  ;;  %v1087_v61 = vadd.f32 %v3092_v18, %v1086_v59  ;;  %v848_v57 = vsel %vm720_vm9, %v613_v41, %v784_v51 }
 0x197   : > { %v894_v2 = vpack.c.bf16 %v848_v57, %v847_v56 }
 0x198   : > { %v1225_v63 = vmax.f32 %v1087_v61, 0.0  ;;  %v605_v0 = vpop.f32.mrf.mxu0  ;;  %2406 = vmatmul.msk.bf16.gmra.mxu1 %vm945_vm3, %v892_v60 }
 0x199   : > { %v606_v6 = vadd.f32 %v3027_v35, %v605_v0 }
 0x19a   : > { %v1293_v4 = vmul.f32 %v3098_v25, %v1225_v63 }
 0x19b   : > { %v781_v14 = vmul.f32 0.01, %v606_v6  ;;  %vm717_vm6 = vcmp.gt.f32.partialorder %v606_v6, 0.0 }
 0x19c   : > { %v1385_v5 = vsel %vm419_vm0, %v1293_v4, 0.0 }
 0x19d   : > { %v1088_v7 = vpop.f32.mrf.mxu1  ;;  %1386 = vadd.xlane.f32.xlu2 %v1385_v5  ;;  %v845_v26 = vsel %vm717_vm6, %v606_v6, %v781_v14  ;;  %v361_v6 = vld [vmem:[%s2984_s20 + $0x1d0] sm:$0xff]  ;;  %v618_v14 = vadd.f32 %v3027_v35, %v3190_v62 }
 0x19e   : > { %v1089_v9 = vadd.f32 %v3092_v18, %v1088_v7  ;;  %v362_v7 = vld [vmem:[%s2984_s20 + $0x1d8] sm:$0xff] }
 0x19f   : > { %vm722_vm12 = vcmp.gt.f32.partialorder %v618_v14, 0.0 }
 0x1a0   : > { %v1226_v11 = vmax.f32 %v1089_v9, 0.0  ;;  %v607_v12 = vpop.f32.mrf.mxu0  ;;  %v1345_v13 = vpop.xlane.xlu0 %1344 }
 0x1a1   : > { %v608_v15 = vadd.f32 %v3027_v35, %v607_v12  ;;  %v1539_v16 = vadd.f32 %v3199_v8, %v1345_v13  ;;  %v616_v13 = vadd.f32 %v3027_v35, %v3184_v49  ;;  %v786_v49 = vmul.f32 0.01, %v618_v14 }
 0x1a2   : > { %v1294_v17 = vmul.f32 %v3098_v25, %v1226_v11  ;;  %v396_v11 = vpack.c.bf16 %v362_v7, %v361_v6 }
 0x1a3   : > { %vm718_vm7 = vcmp.gt.f32.partialorder %v608_v15, 0.0  ;;  %v782_v19 = vmul.f32 0.01, %v608_v15  ;;  %v1603_v20 = vsub.f32 0.0, %v1539_v16  ;;  %vm721_vm11 = vcmp.gt.f32.partialorder %v616_v13, 0.0 }
 0x1a4   : > { %v1388_v21 = vsel %vm419_vm0, %v1294_v17, 0.0  ;;  %2372 = vmatmul.msk.bf16.gmra.mxu3 %vm419_vm0, %v396_v11  ;;  %v850_v34 = vsel %vm722_vm12, %v618_v14, %v786_v49 }
 0x1a5   : > { %v1667_v22 = vmul.f32 1.442695, %v1603_v20  ;;  %v1091_v24 = vpop.f32.mrf.mxu1  ;;  %1389 = vadd.xlane.f32.xlu0 %v1388_v21  ;;  %v846_v27 = vsel %vm718_vm7, %v608_v15, %v782_v19 }
 0x1a6   : > { %v1092_v28 = vadd.f32 %v3092_v18, %v1091_v24  ;;  %v893_v29 = vpack.c.bf16 %v846_v27, %v845_v26  ;;  %v785_v26 = vmul.f32 0.01, %v616_v13  ;;  %v3250_v27 = vpop.f32.mrf.mxu3 }
 0x1a7   : > { %2547 = vpow2.f32 %v1667_v22 }
 0x1a8   : > { %v1227_v31 = vmax.f32 %v1092_v28, 0.0  ;;  %2407 = vmatmul.msk.bf16.vlgmr.msra.gmra.mxu2 %vm945_vm3, %v893_v29  ;;  %v1348_v32 = vpop.xlane.xlu0 %1347  ;;  %v849_v33 = vsel %vm721_vm11, %v616_v13, %v785_v26 }
 0x1a9   : > { %v1540_v36 = vadd.f32 %v3199_v8, %v1348_v32 }
 0x1aa   : > { %v1295_v39 = vmul.f32 %v3098_v25, %v1227_v31 }
 0x1ab   : > { %v1604_v42 = vsub.f32 0.0, %v1540_v36 }
 0x1ac   : > { %v1391_v43 = vsel %vm419_vm0, %v1295_v39, 0.0 }
 0x1ad   : > { %v2548_v44 = vpop.eup %2547  ;;  %v1669_v45 = vmul.f32 1.442695, %v1604_v42  ;;  %v1093_v46 = vpop.f32.mrf.mxu1  ;;  %1392 = vadd.xlane.f32.xlu1 %v1391_v43 }
 0x1ae   : > { %v1795_v47 = vadd.f32 1.0, %v2548_v44  ;;  %v1094_v48 = vadd.f32 %v3092_v18, %v1093_v46  ;;  %v895_v44 = vpack.c.bf16 %v850_v34, %v849_v33 }
 0x1af   : > { %2549 = vpow2.f32 %v1669_v45  ;;  %v3258_v45 = vpop.f32.mrf.mxu3 }
 0x1b0   : > { %2551 = vrcp.f32 %v1795_v47  ;;  %v1228_v38 = vmax.f32 %v1094_v48, 0.0  ;;  %v1351_v52 = vpop.xlane.xlu1 %1350  ;;  %v363_v48 = vld [vmem:[%s2984_s20 + $0x1e0] sm:$0xff] }
 0x1b1   : > { %v1541_v53 = vadd.f32 %v3199_v8, %v1351_v52 }
 0x1b2   : > { %v1296_v54 = vmul.f32 %v3098_v25, %v1228_v38  ;;  %v397_v38 = vpack.c.bf16 %v364_v50, %v363_v48 }
 0x1b3   : > { %v1605_v55 = vsub.f32 0.0, %v1541_v53  ;;  %v621_v53 = vadd.f32 %v3027_v35, %v3202_v10 }
 0x1b4   : > { %v1394_v58 = vsel %vm419_vm0, %v1296_v54, 0.0  ;;  %v623_v54 = vadd.f32 %v3027_v35, %v3209_v30  ;;  %2373 = vmatmul.msk.bf16.gmra.mxu3 %vm419_vm0, %v397_v38 }
 0x1b5   : > { %v2550_v59 = vpop.eup %2549  ;;  %v1671_v60 = vmul.f32 1.442695, %v1605_v55  ;;  %v1096_v61 = vpop.f32.mrf.mxu1  ;;  %1395 = vadd.xlane.f32.xlu2 %v1394_v58  ;;  %vm723_vm13 = vcmp.gt.f32.partialorder %v621_v53, 0.0 }
 0x1b6   : > { %v2552_v63 = vpop.eup %2551  ;;  %v1796_v0 = vadd.f32 1.0, %v2550_v59  ;;  %v1097_v1 = vadd.f32 %v3092_v18, %v1096_v61  ;;  %v788_v10 = vmul.f32 0.01, %v623_v54  ;;  %vm724_vm14 = vcmp.gt.f32.partialorder %v623_v54, 0.0 }
 0x1b7   : > { %1924 = vst.msk [vmem:[%s3230_s26] sm:$0xff] %vm1923_vm10, %v2552_v63  ;;  %2553 = vpow2.f32 %v1671_v60 }
 0x1b8   : > { %2555 = vrcp.f32 %v1796_v0  ;;  %v1229_v4 = vmax.f32 %v1097_v1, 0.0  ;;  %2408 = vmatmul.msk.bf16.gmra.mxu2 %vm945_vm3, %v894_v2  ;;  %v1354_v5 = vpop.xlane.xlu1 %1353  ;;  %v787_v0 = vmul.f32 0.01, %v621_v53  ;;  %v3274_v1 = vpop.f32.mrf.mxu3  ;;  %v852_v7 = vsel %vm724_vm14, %v623_v54, %v788_v10 }
 0x1b9   : > { %v1542_v9 = vadd.f32 %v3199_v8, %v1354_v5 }
 0x1ba   : > { %v1297_v12 = vmul.f32 %v3098_v25, %v1229_v4  ;;  %v851_v6 = vsel %vm723_vm13, %v621_v53, %v787_v0 }
 0x1bb   : > { %v1606_v15 = vsub.f32 0.0, %v1542_v9 }
 0x1bc   : > { %v1397_v16 = vsel %vm419_vm0, %v1297_v12, 0.0 }
 0x1bd   : > { %v2554_v17 = vpop.eup %2553  ;;  %v1673_v19 = vmul.f32 1.442695, %v1606_v15  ;;  %v1098_v20 = vpop.f32.mrf.mxu1  ;;  %1398 = vadd.xlane.f32.xlu0 %v1397_v16 }
 0x1be   : > { %v2556_v21 = vpop.eup %2555  ;;  %v1797_v22 = vadd.f32 1.0, %v2554_v17  ;;  %v1099_v24 = vadd.f32 %v3092_v18, %v1098_v20  ;;  %v896_v17 = vpack.c.bf16 %v852_v7, %v851_v6 }
 0x1bf   : > { %1925 = vst.msk [vmem:[%s3230_s26 + $0x8] sm:$0xff] %vm1923_vm10, %v2556_v21  ;;  %2557 = vpow2.f32 %v1673_v19 }
 0x1c0   : > { %2559 = vrcp.f32 %v1797_v22  ;;  %v1230_v62 = vmax.f32 %v1099_v24, 0.0  ;;  %v1357_v28 = vpop.xlane.xlu2 %1356  ;;  %v3282_v19 = vpop.f32.mrf.mxu3  ;;  %v365_v22 = vld [vmem:[%s2984_s20 + $0x1f0] sm:$0xff]  ;;  %v366_v24 = vld [vmem:[%s2984_s20 + $0x1f8] sm:$0xff] }
 0x1c1   : > { %v1543_v29 = vadd.f32 %v3199_v8, %v1357_v28  ;;  %v398_v49 = vpack.c.bf16 %v366_v24, %v365_v22  ;;  %v3292_v28 = vld [vmem:[%s3830_s2] ss:$0 sm:$0xff] }
 0x1c2   : > { %v1298_v31 = vmul.f32 %v3098_v25, %v1230_v62  ;;  %v631_v10 = vadd.f32 %v3292_v28, %v3250_v27 }
 0x1c3   : > { %v1607_v32 = vsub.f32 0.0, %v1543_v29  ;;  %v626_v29 = vadd.f32 %v3292_v28, %v3224_v23 }
 0x1c4   : > { %v1400_v36 = vsel %vm419_vm0, %v1298_v31, 0.0  ;;  %v628_v31 = vadd.f32 %v3292_v28, %v3234_v3  ;;  %2374 = vmatmul.msk.bf16.gmra.mxu3 %vm419_vm0, %v398_v49  ;;  %vm727_vm2 = vcmp.gt.f32.partialorder %v631_v10, 0.0 }
 0x1c5   : > { %v2558_v37 = vpop.eup %2557  ;;  %v1675_v39 = vmul.f32 1.442695, %v1607_v32  ;;  %v1101_v40 = vpop.f32.mrf.mxu1  ;;  %1401 = vadd.xlane.f32.xlu1 %v1400_v36  ;;  %vm725_vm15 = vcmp.gt.f32.partialorder %v626_v29, 0.0 }
 0x1c6   : > { %v2560_v41 = vpop.eup %2559  ;;  %v1798_v42 = vadd.f32 1.0, %v2558_v37  ;;  %v1102_v43 = vadd.f32 %v3092_v18, %v1101_v40  ;;  %v790_v23 = vmul.f32 0.01, %v628_v31  ;;  %vm726_vm1 = vcmp.gt.f32.partialorder %v628_v31, 0.0 }
 0x1c7   : > { %1926 = vst.msk [vmem:[%s3230_s26 + $0x10] sm:$0xff] %vm1923_vm10, %v2560_v41  ;;  %2561 = vpow2.f32 %v1675_v39 }
 0x1c8   : > { %2563 = vrcp.f32 %v1798_v42  ;;  %v1231_v46 = vmax.f32 %v1102_v43, 0.0  ;;  %2409 = vmatmul.msk.bf16.gmra.mxu2 %vm945_vm3, %v895_v44  ;;  %v1360_v47 = vpop.xlane.xlu2 %1359  ;;  %v789_v42 = vmul.f32 0.01, %v626_v29  ;;  %v3303_v43 = vpop.f32.mrf.mxu3 }
 0x1c9   : > { %v1544_v51 = vadd.f32 %v3199_v8, %v1360_v47 }
 0x1ca   : > { %v1299_v52 = vmul.f32 %v3098_v25, %v1231_v46  ;;  %v853_v50 = vsel %vm725_vm15, %v626_v29, %v789_v42 }
 0x1cb   : > { %v1608_v55 = vsub.f32 0.0, %v1544_v51  ;;  %v854_v51 = vsel %vm726_vm1, %v628_v31, %v790_v23 }
 0x1cc   : > { %v1403_v56 = vsel %vm419_vm0, %v1299_v52, 0.0 }
 0x1cd   : > { %v2562_v57 = vpop.eup %2561  ;;  %v1677_v58 = vmul.f32 1.442695, %v1608_v55  ;;  %v1103_v59 = vpop.f32.mrf.mxu1  ;;  %1404 = vadd.xlane.f32.xlu2 %v1403_v56 }
 0x1ce   : > { %v2564_v60 = vpop.eup %2563  ;;  %v1799_v61 = vadd.f32 1.0, %v2562_v57  ;;  %v1104_v63 = vadd.f32 %v3092_v18, %v1103_v59 }
 0x1cf   : > { %1927 = vst.msk [vmem:[%s3230_s26 + $0x18] sm:$0xff] %vm1923_vm10, %v2564_v60  ;;  %2565 = vpow2.f32 %v1677_v58  ;;  %v897_v58 = vpack.c.bf16 %v854_v51, %v853_v50 }
 0x1d0   : > { %2567 = vrcp.f32 %v1799_v61  ;;  %v1232_v35 = vmax.f32 %v1104_v63, 0.0  ;;  %v1363_v30 = vpop.xlane.xlu0 %1362  ;;  %v3312_v61 = vpop.f32.mrf.mxu3 }
 0x1d1   : > { %v1545_v2 = vadd.f32 %v3199_v8, %v1363_v30 }
 0x1d2   : > { %v1300_v4 = vmul.f32 %v3098_v25, %v1232_v35  ;;  %v633_v35 = vadd.f32 %v3292_v28, %v3258_v45 }
 0x1d3   : > { %v1609_v5 = vsub.f32 0.0, %v1545_v2 }
 0x1d4   : > { %v1406_v9 = vsel %vm419_vm0, %v1300_v4, 0.0  ;;  %vm728_vm4 = vcmp.gt.f32.partialorder %v633_v35, 0.0 }
 0x1d5   : > { %v2566_v11 = vpop.eup %2565  ;;  %v1679_v12 = vmul.f32 1.442695, %v1609_v5  ;;  %v1106_v13 = vpop.f32.mrf.mxu1  ;;  %1407 = vadd.xlane.f32.xlu0 %v1406_v9 }
 0x1d6   : > { %v2568_v14 = vpop.eup %2567  ;;  %v1800_v15 = vadd.f32 1.0, %v2566_v11  ;;  %v1107_v16 = vadd.f32 %v3092_v18, %v1106_v13  ;;  %v792_v13 = vmul.f32 0.01, %v633_v35 }
 0x1d7   : > { %1928 = vst.msk [vmem:[%s3230_s26 + $0x20] sm:$0xff] %vm1923_vm10, %v2568_v14  ;;  %2569 = vpow2.f32 %v1679_v12  ;;  %v791_v12 = vmul.f32 0.01, %v631_v10 }
 0x1d8   : > { %2571 = vrcp.f32 %v1800_v15  ;;  %v1233_v20 = vmax.f32 %v1107_v16, 0.0  ;;  %2410 = vmatmul.msk.bf16.gmra.mxu2 %vm945_vm3, %v896_v17  ;;  %v1366_v21 = vpop.xlane.xlu1 %1365  ;;  %v3326_v16 = vpop.f32.mrf.mxu3 }
 0x1d9   : > { %v1546_v26 = vadd.f32 %v3199_v8, %v1366_v21  ;;  %v856_v21 = vsel %vm728_vm4, %v633_v35, %v792_v13 }
 0x1da   : > { %v1301_v62 = vmul.f32 %v3098_v25, %v1233_v20  ;;  %v855_v20 = vsel %vm727_vm2, %v631_v10, %v791_v12 }
 0x1db   : > { %v1610_v32 = vsub.f32 0.0, %v1546_v26 }
 0x1dc   : > { %v1409_v33 = vsel %vm419_vm0, %v1301_v62, 0.0 }
 0x1dd   : > { %v2570_v34 = vpop.eup %2569  ;;  %v1681_v36 = vmul.f32 1.442695, %v1610_v32  ;;  %v1108_v37 = vpop.f32.mrf.mxu1  ;;  %1410 = vadd.xlane.f32.xlu1 %v1409_v33  ;;  %v898_v32 = vpack.c.bf16 %v856_v21, %v855_v20 }
 0x1de   : > { %v2572_v39 = vpop.eup %2571  ;;  %v1801_v40 = vadd.f32 1.0, %v2570_v34  ;;  %v1109_v41 = vadd.f32 %v3092_v18, %v1108_v37 }
 0x1df   : > { %1929 = vst.msk [vmem:[%s3230_s26 + $0x28] sm:$0xff] %vm1923_vm10, %v2572_v39  ;;  %2573 = vpow2.f32 %v1681_v36  ;;  %v636_v39 = vadd.f32 %v3292_v28, %v3274_v1 }
 0x1e0   : > { %2575 = vrcp.f32 %v1801_v40  ;;  %v1234_v3 = vmax.f32 %v1109_v41, 0.0  ;;  %v1369_v44 = vpop.xlane.xlu2 %1368  ;;  %v638_v40 = vadd.f32 %v3292_v28, %v3282_v19  ;;  %v3340_v23 = vpop.f32.mrf.mxu3 }
 0x1e1   : > { %v1547_v46 = vadd.f32 %v3199_v8, %v1369_v44  ;;  %v793_v51 = vmul.f32 0.01, %v636_v39  ;;  %vm729_vm5 = vcmp.gt.f32.partialorder %v636_v39, 0.0 }
 0x1e2   : > { %v1302_v47 = vmul.f32 %v3098_v25, %v1234_v3  ;;  %v794_v1 = vmul.f32 0.01, %v638_v40  ;;  %vm730_vm6 = vcmp.gt.f32.partialorder %v638_v40, 0.0 }
 0x1e3   : > { %v1611_v48 = vsub.f32 0.0, %v1547_v46 }
 0x1e4   : > { %v1412_v38 = vsel %vm419_vm0, %v1302_v47, 0.0 }
 0x1e5   : > { %v2574_v52 = vpop.eup %2573  ;;  %v1683_v53 = vmul.f32 1.442695, %v1611_v48  ;;  %v1111_v54 = vpop.f32.mrf.mxu1  ;;  %1413 = vadd.xlane.f32.xlu2 %v1412_v38 }
 0x1e6   : > { %v2576_v55 = vpop.eup %2575  ;;  %v1802_v56 = vadd.f32 1.0, %v2574_v52  ;;  %v1112_v57 = vadd.f32 %v3092_v18, %v1111_v54 }
 0x1e7   : > { %1930 = vst.msk [vmem:[%s3230_s26 + $0x30] sm:$0xff] %vm1923_vm10, %v2576_v55  ;;  %2577 = vpow2.f32 %v1683_v53  ;;  %v857_v55 = vsel %vm729_vm5, %v636_v39, %v793_v51 }
 0x1e8   : > { %2579 = vrcp.f32 %v1802_v56  ;;  %v1235_v59 = vmax.f32 %v1112_v57, 0.0  ;;  %2411 = vmatmul.msk.bf16.gmra.mxu2 %vm945_vm3, %v897_v58  ;;  %v1372_v60 = vpop.xlane.xlu0 %1371  ;;  %v858_v56 = vsel %vm730_vm6, %v638_v40, %v794_v1 }
 0x1e9   : > { %v1548_v63 = vadd.f32 %v3199_v8, %v1372_v60  ;;  %v899_v35 = vpack.c.bf16 %v858_v56, %v857_v55 }
 0x1ea   : > { %v1303_v0 = vmul.f32 %v3098_v25, %v1235_v59 }
 0x1eb   : > { %v1612_v30 = vsub.f32 0.0, %v1548_v63 }
 0x1ec   : > { %v1415_v2 = vsel %vm419_vm0, %v1303_v0, 0.0  ;;  %v3351_v0 = vld [vmem:[%s3832_s4] ss:$0 sm:$0xff] }
 0x1ed   : > { %v2578_v4 = vpop.eup %2577  ;;  %v1685_v5 = vmul.f32 1.442695, %v1612_v30  ;;  %v1113_v6 = vpop.f32.mrf.mxu1  ;;  %1416 = vadd.xlane.f32.xlu0 %v1415_v2 }
 0x1ee   : > { %v2580_v7 = vpop.eup %2579  ;;  %v1803_v9 = vadd.f32 1.0, %v2578_v4  ;;  %v1114_v11 = vadd.f32 %v3092_v18, %v1113_v6 }
 0x1ef   : > { %1931 = vst.msk [vmem:[%s3230_s26 + $0x38] sm:$0xff] %vm1923_vm10, %v2580_v7  ;;  %2581 = vpow2.f32 %v1685_v5  ;;  %v3363_v5 = vld [vmem:[%s3833_s5] ss:$0 sm:$0xff]  ;;  %v641_v7 = vadd.f32 %v3292_v28, %v3303_v43 }
 0x1f0   : > { %2583 = vrcp.f32 %v1803_v9  ;;  %v1236_v27 = vmax.f32 %v1114_v11, 0.0  ;;  %v1375_v45 = vpop.xlane.xlu1 %1374  ;;  %v643_v9 = vadd.f32 %v3292_v28, %v3312_v61 }
 0x1f1   : > { %v1549_v14 = vadd.f32 %v3199_v8, %v1375_v45  ;;  %v795_v20 = vmul.f32 0.01, %v641_v7  ;;  %vm731_vm7 = vcmp.gt.f32.partialorder %v641_v7, 0.0 }
 0x1f2   : > { %v1304_v15 = vmul.f32 %v3098_v25, %v1236_v27  ;;  %v796_v21 = vmul.f32 0.01, %v643_v9  ;;  %vm732_vm8 = vcmp.gt.f32.partialorder %v643_v9, 0.0 }
 0x1f3   : > { %v1613_v17 = vsub.f32 0.0, %v1549_v14 }
 0x1f4   : > { %v1418_v22 = vsel %vm419_vm0, %v1304_v15, 0.0 }
 0x1f5   : > { %v2582_v24 = vpop.eup %2581  ;;  %v1687_v26 = vmul.f32 1.442695, %v1613_v17  ;;  %v1116_v49 = vpop.f32.mrf.mxu1  ;;  %1419 = vadd.xlane.f32.xlu1 %v1418_v22 }
 0x1f6   : > { %v2584_v62 = vpop.eup %2583  ;;  %v1804_v29 = vadd.f32 1.0, %v2582_v24  ;;  %v1117_v31 = vadd.f32 %v3092_v18, %v1116_v49 }
 0x1f7   : > { %1932 = vst.msk [vmem:[%s3230_s26 + $0x40] sm:$0xff] %vm1923_vm10, %v2584_v62  ;;  %2585 = vpow2.f32 %v1687_v26  ;;  %v859_v62 = vsel %vm731_vm7, %v641_v7, %v795_v20 }
 0x1f8   : > { %2587 = vrcp.f32 %v1804_v29  ;;  %v1237_v33 = vmax.f32 %v1117_v31, 0.0  ;;  %2412 = vmatmul.msk.bf16.gmra.mxu2 %vm945_vm3, %v898_v32  ;;  %v1378_v34 = vpop.xlane.xlu2 %1377  ;;  %v860_v29 = vsel %vm732_vm8, %v643_v9, %v796_v21 }
 0x1f9   : > { %v1550_v36 = vadd.f32 %v3199_v8, %v1378_v34  ;;  %v900_v40 = vpack.c.bf16 %v860_v29, %v859_v62 }
 0x1fa   : > { %v1305_v37 = vmul.f32 %v3098_v25, %v1237_v33 }
 0x1fb   : > { %v1614_v41 = vsub.f32 0.0, %v1550_v36 }
 0x1fc   : > { %v1421_v42 = vsel %vm419_vm0, %v1305_v37, 0.0 }
 0x1fd   : > { %v2586_v3 = vpop.eup %2585  ;;  %v1689_v44 = vmul.f32 1.442695, %v1614_v41  ;;  %v1118_v46 = vpop.f32.mrf.mxu1  ;;  %1422 = vadd.xlane.f32.xlu2 %v1421_v42 }
 0x1fe   : > { %v2588_v47 = vpop.eup %2587  ;;  %v1805_v48 = vadd.f32 1.0, %v2586_v3  ;;  %v1119_v50 = vadd.f32 %v3092_v18, %v1118_v46 }
 0x1ff   : > { %1933 = vst.msk [vmem:[%s3230_s26 + $0x48] sm:$0xff] %vm1923_vm10, %v2588_v47  ;;  %2589 = vpow2.f32 %v1689_v44  ;;  %v646_v47 = vadd.f32 %v3292_v28, %v3326_v16 }
 0x200   : > { %2591 = vrcp.f32 %v1805_v48  ;;  %v1238_v19 = vmax.f32 %v1119_v50, 0.0  ;;  %v1381_v38 = vpop.xlane.xlu0 %1380  ;;  %v648_v48 = vadd.f32 %v3292_v28, %v3340_v23 }
 0x201   : > { %v1551_v52 = vadd.f32 %v3199_v8, %v1381_v38  ;;  %v797_v55 = vmul.f32 0.01, %v646_v47  ;;  %vm733_vm9 = vcmp.gt.f32.partialorder %v646_v47, 0.0 }
 0x202   : > { %v1306_v53 = vmul.f32 %v3098_v25, %v1238_v19  ;;  %v3354_v25 = vpop.f32.mrf.mxu3  ;;  %v798_v56 = vmul.f32 0.01, %v648_v48  ;;  %vm734_vm11 = vcmp.gt.f32.partialorder %v648_v48, 0.0 }
 0x203   : > { %v1615_v54 = vsub.f32 0.0, %v1551_v52 }
 0x204   : > { %v1424_v18 = vsel %vm419_vm0, %v1306_v53, 0.0 }
 0x205   : > { %v2590_v57 = vpop.eup %2589  ;;  %v1691_v58 = vmul.f32 1.442695, %v1615_v54  ;;  %v1121_v59 = vpop.f32.mrf.mxu1  ;;  %1425 = vadd.xlane.f32.xlu0 %v1424_v18 }
 0x206   : > { %v2592_v60 = vpop.eup %2591  ;;  %v1806_v63 = vadd.f32 1.0, %v2590_v57  ;;  %v1122_v10 = vadd.f32 %v3351_v0, %v1121_v59  ;;  %v861_v59 = vsel %vm733_vm9, %v646_v47, %v797_v55 }
 0x207   : > { %1934 = vst.msk [vmem:[%s3230_s26 + $0x50] sm:$0xff] %vm1923_vm10, %v2592_v60  ;;  %2593 = vpow2.f32 %v1691_v58  ;;  %v862_v60 = vsel %vm734_vm11, %v648_v48, %v798_v56 }
 0x208   : > { %2595 = vrcp.f32 %v1806_v63  ;;  %v1239_v30 = vmax.f32 %v1122_v10, 0.0  ;;  %2413 = vmatmul.msk.bf16.gmra.mxu2 %vm945_vm3, %v899_v35  ;;  %v1384_v2 = vpop.xlane.xlu1 %1383 }
 0x209   : > { %v1552_v4 = vadd.f32 %v3199_v8, %v1384_v2 }
 0x20a   : > { %v1307_v6 = vmul.f32 %v3363_v5, %v1239_v30  ;;  %v3374_v22 = vpop.f32.mrf.mxu3 }
 0x20b   : > { %v1616_v11 = vsub.f32 0.0, %v1552_v4 }
 0x20c   : > { %v1427_v12 = vsel %vm419_vm0, %v1307_v6, 0.0  ;;  %v901_v6 = vpack.c.bf16 %v862_v60, %v861_v59 }
 0x20d   : > { %v2594_v13 = vpop.eup %2593  ;;  %v1693_v27 = vmul.f32 1.442695, %v1616_v11  ;;  %v1123_v45 = vpop.f32.mrf.mxu1  ;;  %1428 = vadd.xlane.f32.xlu1 %v1427_v12  ;;  %v651_v11 = vadd.f32 %v3292_v28, %v3354_v25  ;;  %v653_v12 = vadd.f32 %v3292_v28, %v3374_v22 }
 0x20e   : > { %v2596_v14 = vpop.eup %2595  ;;  %v1807_v15 = vadd.f32 1.0, %v2594_v13  ;;  %v1124_v17 = vadd.f32 %v3351_v0, %v1123_v45 }
 0x20f   : > { %1935 = vst.msk [vmem:[%s3230_s26 + $0x58] sm:$0xff] %vm1923_vm10, %v2596_v14  ;;  %2597 = vpow2.f32 %v1693_v27  ;;  %vm735_vm12 = vcmp.gt.f32.partialorder %v651_v11, 0.0  ;;  %vm736_vm13 = vcmp.gt.f32.partialorder %v653_v12, 0.0 }
 0x210   : > { %2599 = vrcp.f32 %v1807_v15  ;;  %v1240_v43 = vmax.f32 %v1124_v17, 0.0  ;;  %v1387_v61 = vpop.xlane.xlu2 %1386 }
 0x211   : > { %v1553_v24 = vadd.f32 %v3199_v8, %v1387_v61  ;;  %v799_v61 = vmul.f32 0.01, %v651_v11 }
 0x212   : > { %v1308_v26 = vmul.f32 %v3363_v5, %v1240_v43  ;;  %v3385_v46 = vpop.f32.mrf.mxu3 }
 0x213   : > { %v1617_v49 = vsub.f32 0.0, %v1553_v24  ;;  %v800_v24 = vmul.f32 0.01, %v653_v12 }
 0x214   : > { %v1430_v31 = vsel %vm419_vm0, %v1308_v26, 0.0 }
 0x215   : > { %v2598_v32 = vpop.eup %2597  ;;  %v1695_v33 = vmul.f32 1.442695, %v1617_v49  ;;  %v1126_v34 = vpop.f32.mrf.mxu1  ;;  %1431 = vadd.xlane.f32.xlu2 %v1430_v31  ;;  %v863_v31 = vsel %vm735_vm12, %v651_v11, %v799_v61 }
 0x216   : > { %v2600_v36 = vpop.eup %2599  ;;  %v1808_v37 = vadd.f32 1.0, %v2598_v32  ;;  %v1127_v39 = vadd.f32 %v3351_v0, %v1126_v34  ;;  %v864_v32 = vsel %vm736_vm13, %v653_v12, %v800_v24 }
 0x217   : > { %1936 = vst.msk [vmem:[%s3230_s26 + $0x60] sm:$0xff] %vm1923_vm10, %v2600_v36  ;;  %2601 = vpow2.f32 %v1695_v33 }
 0x218   : > { %2603 = vrcp.f32 %v1808_v37  ;;  %v1241_v41 = vmax.f32 %v1127_v39, 0.0  ;;  %2414 = vmatmul.msk.bf16.gmra.mxu2 %vm945_vm3, %v900_v40  ;;  %v1390_v42 = vpop.xlane.xlu0 %1389 }
 0x219   : > { %v1554_v3 = vadd.f32 %v3199_v8, %v1390_v42 }
 0x21a   : > { %v1309_v44 = vmul.f32 %v3363_v5, %v1241_v41  ;;  %v657_v10 = vpop.f32.mrf.mxu3  ;;  %v902_v41 = vpack.c.bf16 %v864_v32, %v863_v31 }
 0x21b   : > { %v1618_v50 = vsub.f32 0.0, %v1554_v3 }
 0x21c   : > { %v1433_v51 = vsel %vm419_vm0, %v1309_v44, 0.0 }
 0x21d   : > { %v2602_v1 = vpop.eup %2601  ;;  %v1697_v19 = vmul.f32 1.442695, %v1618_v50  ;;  %v1128_v38 = vpop.f32.mrf.mxu1  ;;  %1434 = vadd.xlane.f32.xlu0 %v1433_v51  ;;  %v656_v50 = vadd.f32 %v3292_v28, %v3385_v46  ;;  %v658_v51 = vadd.f32 %v3292_v28, %v657_v10 }
 0x21e   : > { %v2604_v52 = vpop.eup %2603  ;;  %v1809_v53 = vadd.f32 1.0, %v2602_v1  ;;  %v1129_v54 = vadd.f32 %v3351_v0, %v1128_v38 }
 0x21f   : > { %1937 = vst.msk [vmem:[%s3230_s26 + $0x68] sm:$0xff] %vm1923_vm10, %v2604_v52  ;;  %2605 = vpow2.f32 %v1697_v19  ;;  %vm737_vm14 = vcmp.gt.f32.partialorder %v656_v50, 0.0  ;;  %vm738_vm15 = vcmp.gt.f32.partialorder %v658_v51, 0.0 }
 0x220   : > { %2607 = vrcp.f32 %v1809_v53  ;;  %v1242_v16 = vmax.f32 %v1129_v54, 0.0  ;;  %v1393_v23 = vpop.xlane.xlu1 %1392 }
 0x221   : > { %v1555_v18 = vadd.f32 %v3199_v8, %v1393_v23  ;;  %v802_v23 = vmul.f32 0.01, %v658_v51 }
 0x222   : > { %v1310_v57 = vmul.f32 %v3363_v5, %v1242_v16  ;;  %v3407_v43 = vpop.f32.mrf.mxu3  ;;  %v801_v16 = vmul.f32 0.01, %v656_v50 }
 0x223   : > { %v1619_v58 = vsub.f32 0.0, %v1555_v18 }
 0x224   : > { %v1436_v63 = vsel %vm419_vm0, %v1310_v57, 0.0  ;;  %v865_v10 = vsel %vm737_vm14, %v656_v50, %v801_v16 }
 0x225   : > { %v2606_v35 = vpop.eup %2605  ;;  %v1699_v30 = vmul.f32 1.442695, %v1619_v58  ;;  %1437 = vadd.xlane.f32.xlu1 %v1436_v63 }
 0x226   : > { %v2608_v2 = vpop.eup %2607  ;;  %v1810_v4 = vadd.f32 1.0, %v2606_v35  ;;  %v866_v35 = vsel %vm738_vm15, %v658_v51, %v802_v23 }
 0x227   : > { %1938 = vst.msk [vmem:[%s3230_s26 + $0x70] sm:$0xff] %vm1923_vm10, %v2608_v2  ;;  %2609 = vpow2.f32 %v1699_v30  ;;  %v903_v11 = vpack.c.bf16 %v866_v35, %v865_v10 }
 0x228   : > { %2611 = vrcp.f32 %v1810_v4  ;;  %2415 = vmatmul.msk.bf16.gmra.mxu2 %vm945_vm3, %v901_v6  ;;  %v1396_v7 = vpop.xlane.xlu2 %1395 }
 0x229   : > { %v1556_v9 = vadd.f32 %v3199_v8, %v1396_v7 }
 0x22a   : > { %v662_v44 = vpop.f32.mrf.mxu3 }
 0x22b   : > { %v1620_v13 = vsub.f32 0.0, %v1556_v9  ;;  %v1131_v27 = vpop.f32.mrf.mxu2 }
 0x22c   : > { %v1132_v45 = vadd.f32 %v3351_v0, %v1131_v27 }
 0x22d   : > { %v2610_v14 = vpop.eup %2609  ;;  %v1701_v15 = vmul.f32 1.442695, %v1620_v13 }
 0x22e   : > { %v2612_v17 = vpop.eup %2611  ;;  %v1811_v20 = vadd.f32 1.0, %v2610_v14  ;;  %v1243_v21 = vmax.f32 %v1132_v45, 0.0  ;;  %v661_v14 = vadd.f32 %v3292_v28, %v3407_v43 }
 0x22f   : > { %1939 = vst.msk [vmem:[%s3230_s26 + $0x78] sm:$0xff] %vm1923_vm10, %v2612_v17  ;;  %2613 = vpow2.f32 %v1701_v15  ;;  %v663_v15 = vadd.f32 %v3292_v28, %v662_v44 }
 0x230   : > { %2615 = vrcp.f32 %v1811_v20  ;;  %v1399_v25 = vpop.xlane.xlu0 %1398  ;;  %v1311_v22 = vmul.f32 %v3363_v5, %v1243_v21  ;;  %vm739_vm1 = vcmp.gt.f32.partialorder %v661_v14, 0.0 }
 0x231   : > { %v1557_v26 = vadd.f32 %v3199_v8, %v1399_v25  ;;  %vm740_vm2 = vcmp.gt.f32.partialorder %v663_v15, 0.0 }
 0x232   : > { %v1439_v49 = vsel %vm419_vm0, %v1311_v22, 0.0  ;;  %v3430_v59 = vpop.f32.mrf.mxu3 }
 0x233   : > { %v1621_v62 = vsub.f32 0.0, %v1557_v26  ;;  %v1133_v29 = vpop.f32.mrf.mxu2  ;;  %1440 = vadd.xlane.f32.xlu2 %v1439_v49 }
 0x234   : > { %v1134_v33 = vadd.f32 %v3351_v0, %v1133_v29  ;;  %v804_v29 = vmul.f32 0.01, %v663_v15 }
 0x235   : > { %v2614_v34 = vpop.eup %2613  ;;  %v1703_v36 = vmul.f32 1.442695, %v1621_v62  ;;  %v803_v62 = vmul.f32 0.01, %v661_v14 }
 0x236   : > { %v2616_v37 = vpop.eup %2615  ;;  %v1812_v39 = vadd.f32 1.0, %v2614_v34  ;;  %v1244_v40 = vmax.f32 %v1134_v33, 0.0 }
 0x237   : > { %1940 = vst.msk [vmem:[%s3230_s26 + $0x80] sm:$0xff] %vm1923_vm10, %v2616_v37  ;;  %2617 = vpow2.f32 %v1703_v36  ;;  %v867_v37 = vsel %vm739_vm1, %v661_v14, %v803_v62 }
 0x238   : > { %2619 = vrcp.f32 %v1812_v39  ;;  %2416 = vmatmul.msk.bf16.gmra.mxu2 %vm945_vm3, %v902_v41  ;;  %v1402_v42 = vpop.xlane.xlu1 %1401  ;;  %v1312_v3 = vmul.f32 %v3363_v5, %v1244_v40  ;;  %v868_v39 = vsel %vm740_vm2, %v663_v15, %v804_v29 }
 0x239   : > { %v1558_v47 = vadd.f32 %v3199_v8, %v1402_v42 }
 0x23a   : > { %v1442_v48 = vsel %vm419_vm0, %v1312_v3, 0.0  ;;  %v667_v61 = vpop.f32.mrf.mxu3 }
 0x23b   : > { %v1622_v1 = vsub.f32 0.0, %v1558_v47  ;;  %v1136_v19 = vpop.f32.mrf.mxu2  ;;  %1443 = vadd.xlane.f32.xlu0 %v1442_v48  ;;  %v904_v48 = vpack.c.bf16 %v868_v39, %v867_v37 }
 0x23c   : > { %v1137_v38 = vadd.f32 %v3351_v0, %v1136_v19 }
 0x23d   : > { %v2618_v52 = vpop.eup %2617  ;;  %v1705_v53 = vmul.f32 1.442695, %v1622_v1  ;;  %v3453_v1 = vld [vmem:[#allocation2] ss:$0 sm:$0xff] }
 0x23e   : > { %v2620_v54 = vpop.eup %2619  ;;  %v1813_v55 = vadd.f32 1.0, %v2618_v52  ;;  %v1245_v56 = vmax.f32 %v1137_v38, 0.0  ;;  %v666_v52 = vadd.f32 %v3292_v28, %v3430_v59 }
 0x23f   : > { %1941 = vst.msk [vmem:[%s3230_s26 + $0x88] sm:$0xff] %vm1923_vm10, %v2620_v54  ;;  %2621 = vpow2.f32 %v1705_v53  ;;  %v668_v53 = vadd.f32 %v3292_v28, %v667_v61 }
 0x240   : > { %2623 = vrcp.f32 %v1813_v55  ;;  %v1405_v46 = vpop.xlane.xlu2 %1404  ;;  %v1313_v18 = vmul.f32 %v3363_v5, %v1245_v56  ;;  %vm741_vm4 = vcmp.gt.f32.partialorder %v666_v52, 0.0 }
 0x241   : > { %v1559_v57 = vadd.f32 %v3199_v8, %v1405_v46  ;;  %vm742_vm5 = vcmp.gt.f32.partialorder %v668_v53, 0.0 }
 0x242   : > { %v1445_v58 = vsel %vm419_vm0, %v1313_v18, 0.0  ;;  %v670_v50 = vpop.f32.mrf.mxu3 }
 0x243   : > { %v1623_v60 = vsub.f32 0.0, %v1559_v57  ;;  %v1138_v63 = vpop.f32.mrf.mxu2  ;;  %1446 = vadd.xlane.f32.xlu1 %v1445_v58  ;;  %v805_v58 = vmul.f32 0.01, %v666_v52 }
 0x244   : > { %v1139_v30 = vadd.f32 %v3351_v0, %v1138_v63 }
 0x245   : > { %v2622_v2 = vpop.eup %2621  ;;  %v1707_v4 = vmul.f32 1.442695, %v1623_v60  ;;  %v806_v60 = vmul.f32 0.01, %v668_v53 }
 0x246   : > { %v2624_v6 = vpop.eup %2623  ;;  %v1814_v7 = vadd.f32 1.0, %v2622_v2  ;;  %v1246_v9 = vmax.f32 %v1139_v30, 0.0  ;;  %v869_v2 = vsel %vm741_vm4, %v666_v52, %v805_v58 }
 0x247   : > { %1942 = vst.msk [vmem:[%s3230_s26 + $0x90] sm:$0xff] %vm1923_vm10, %v2624_v6  ;;  %2625 = vpow2.f32 %v1707_v4  ;;  %v870_v4 = vsel %vm742_vm5, %v668_v53, %v806_v60 }
 0x248   : > { %2627 = vrcp.f32 %v1814_v7  ;;  %2417 = vmatmul.msk.bf16.gmra.mxu2 %vm945_vm3, %v903_v11  ;;  %v1408_v12 = vpop.xlane.xlu0 %1407  ;;  %v1314_v13 = vmul.f32 %v3363_v5, %v1246_v9 }
 0x249   : > { %v1560_v27 = vadd.f32 %v3199_v8, %v1408_v12 }
 0x24a   : > { %v1448_v45 = vsel %vm419_vm0, %v1314_v13, 0.0  ;;  %v672_v10 = vpop.f32.mrf.mxu3 }
 0x24b   : > { %v1624_v17 = vsub.f32 0.0, %v1560_v27  ;;  %v1141_v20 = vpop.f32.mrf.mxu2  ;;  %1449 = vadd.xlane.f32.xlu2 %v1448_v45  ;;  %v905_v27 = vpack.c.bf16 %v870_v4, %v869_v2 }
 0x24c   : > { %v1142_v21 = vadd.f32 %v3351_v0, %v1141_v20 }
 0x24d   : > { %v2626_v24 = vpop.eup %2625  ;;  %v1709_v25 = vmul.f32 1.442695, %v1624_v17 }
 0x24e   : > { %v2628_v22 = vpop.eup %2627  ;;  %v1815_v26 = vadd.f32 1.0, %v2626_v24  ;;  %v1247_v49 = vmax.f32 %v1142_v21, 0.0  ;;  %v671_v24 = vadd.f32 %v3292_v28, %v670_v50 }
 0x24f   : > { %1943 = vst.msk [vmem:[%s3230_s26 + $0x98] sm:$0xff] %vm1923_vm10, %v2628_v22  ;;  %2629 = vpow2.f32 %v1709_v25  ;;  %v673_v25 = vadd.f32 %v3292_v28, %v672_v10 }
 0x250   : > { %2631 = vrcp.f32 %v1815_v26  ;;  %v1411_v43 = vpop.xlane.xlu1 %1410  ;;  %v1315_v31 = vmul.f32 %v3363_v5, %v1247_v49  ;;  %vm743_vm6 = vcmp.gt.f32.partialorder %v671_v24, 0.0 }
 0x251   : > { %v1561_v32 = vadd.f32 %v3199_v8, %v1411_v43  ;;  %vm744_vm7 = vcmp.gt.f32.partialorder %v673_v25, 0.0 }
 0x252   : > { %v1451_v33 = vsel %vm419_vm0, %v1315_v31, 0.0  ;;  %v675_v61 = vpop.f32.mrf.mxu3 }
 0x253   : > { %v1625_v34 = vsub.f32 0.0, %v1561_v32  ;;  %v1143_v36 = vpop.f32.mrf.mxu2  ;;  %1452 = vadd.xlane.f32.xlu0 %v1451_v33  ;;  %v807_v33 = vmul.f32 0.01, %v671_v24 }
 0x254   : > { %v1144_v40 = vadd.f32 %v3351_v0, %v1143_v36 }
 0x255   : > { %v2630_v41 = vpop.eup %2629  ;;  %v1711_v42 = vmul.f32 1.442695, %v1625_v34  ;;  %v808_v34 = vmul.f32 0.01, %v673_v25 }
 0x256   : > { %v2632_v3 = vpop.eup %2631  ;;  %v1816_v44 = vadd.f32 1.0, %v2630_v41  ;;  %v1248_v47 = vmax.f32 %v1144_v40, 0.0  ;;  %v871_v41 = vsel %vm743_vm6, %v671_v24, %v807_v33 }
 0x257   : > { %1944 = vst.msk [vmem:[%s3230_s26 + $0xa0] sm:$0xff] %vm1923_vm10, %v2632_v3  ;;  %2633 = vpow2.f32 %v1711_v42  ;;  %v872_v42 = vsel %vm744_vm7, %v673_v25, %v808_v34 }
 0x258   : > { %2635 = vrcp.f32 %v1816_v44  ;;  %2418 = vmatmul.msk.bf16.gmra.mxu2 %vm945_vm3, %v904_v48  ;;  %v1414_v8 = vpop.xlane.xlu2 %1413  ;;  %v1316_v51 = vmul.f32 %v3363_v5, %v1248_v47 }
 0x259   : > { %v1562_v19 = vadd.f32 %v3453_v1, %v1414_v8 }
 0x25a   : > { %v1454_v38 = vsel %vm419_vm0, %v1316_v51, 0.0  ;;  %v677_v48 = vpop.f32.mrf.mxu3 }
 0x25b   : > { %v1626_v54 = vsub.f32 0.0, %v1562_v19  ;;  %v1146_v55 = vpop.f32.mrf.mxu2  ;;  %1455 = vadd.xlane.f32.xlu1 %v1454_v38  ;;  %v906_v19 = vpack.c.bf16 %v872_v42, %v871_v41 }
 0x25c   : > { %v1147_v56 = vadd.f32 %v3351_v0, %v1146_v55 }
 0x25d   : > { %v2634_v16 = vpop.eup %2633  ;;  %v1713_v23 = vmul.f32 1.442695, %v1626_v54 }
 0x25e   : > { %v2636_v46 = vpop.eup %2635  ;;  %v1817_v18 = vadd.f32 1.0, %v2634_v16  ;;  %v1249_v57 = vmax.f32 %v1147_v56, 0.0  ;;  %v676_v16 = vadd.f32 %v3292_v28, %v675_v61 }
 0x25f   : > { %1945 = vst.msk [vmem:[%s3230_s26 + $0xa8] sm:$0xff] %vm1923_vm10, %v2636_v46  ;;  %2637 = vpow2.f32 %v1713_v23  ;;  %v678_v23 = vadd.f32 %v3292_v28, %v677_v48 }
 0x260   : > { %2639 = vrcp.f32 %v1817_v18  ;;  %v1417_v59 = vpop.xlane.xlu0 %1416  ;;  %v1317_v63 = vmul.f32 %v3363_v5, %v1249_v57  ;;  %vm745_vm8 = vcmp.gt.f32.partialorder %v676_v16, 0.0 }
 0x261   : > { %v1563_v35 = vadd.f32 %v3453_v1, %v1417_v59  ;;  %v810_v2 = vmul.f32 0.01, %v678_v23  ;;  %vm746_vm9 = vcmp.gt.f32.partialorder %v678_v23, 0.0 }
 0x262   : > { %v1457_v30 = vsel %vm419_vm0, %v1317_v63, 0.0 }
 0x263   : > { %v1627_v6 = vsub.f32 0.0, %v1563_v35  ;;  %v1148_v7 = vpop.f32.mrf.mxu2  ;;  %1458 = vadd.xlane.f32.xlu2 %v1457_v30  ;;  %v680_v35 = vpop.f32.mrf.mxu3  ;;  %v809_v30 = vmul.f32 0.01, %v676_v16 }
 0x264   : > { %v1149_v9 = vadd.f32 %v3351_v0, %v1148_v7 }
 0x265   : > { %v2638_v11 = vpop.eup %2637  ;;  %v1715_v12 = vmul.f32 1.442695, %v1627_v6 }
 0x266   : > { %v2640_v13 = vpop.eup %2639  ;;  %v1818_v45 = vadd.f32 1.0, %v2638_v11  ;;  %v1250_v14 = vmax.f32 %v1149_v9, 0.0  ;;  %v873_v11 = vsel %vm745_vm8, %v676_v16, %v809_v30 }
 0x267   : > { %1946 = vst.msk [vmem:[%s3230_s26 + $0xb0] sm:$0xff] %vm1923_vm10, %v2640_v13  ;;  %2641 = vpow2.f32 %v1715_v12  ;;  %v874_v12 = vsel %vm746_vm9, %v678_v23, %v810_v2 }
 0x268   : > { %2643 = vrcp.f32 %v1818_v45  ;;  %2419 = vmatmul.msk.bf16.gmra.mxu2 %vm945_vm3, %v905_v27  ;;  %v1420_v15 = vpop.xlane.xlu1 %1419  ;;  %v1318_v17 = vmul.f32 %v3363_v5, %v1250_v14 }
 0x269   : > { %v1564_v20 = vadd.f32 %v3453_v1, %v1420_v15 }
 0x26a   : > { %v1460_v21 = vsel %vm419_vm0, %v1318_v17, 0.0 }
 0x26b   : > { %v1628_v22 = vsub.f32 0.0, %v1564_v20  ;;  %v1151_v26 = vpop.f32.mrf.mxu2  ;;  %1461 = vadd.xlane.f32.xlu0 %v1460_v21  ;;  %v907_v20 = vpack.c.bf16 %v874_v12, %v873_v11  ;;  %v682_v24 = vpop.f32.mrf.mxu3 }
 0x26c   : > { %v1152_v49 = vadd.f32 %v3351_v0, %v1151_v26 }
 0x26d   : > { %v2642_v62 = vpop.eup %2641  ;;  %v1717_v29 = vmul.f32 1.442695, %v1628_v22 }
 0x26e   : > { %v2644_v43 = vpop.eup %2643  ;;  %v1819_v31 = vadd.f32 1.0, %v2642_v62  ;;  %v1251_v32 = vmax.f32 %v1152_v49, 0.0  ;;  %v681_v62 = vadd.f32 %v3292_v28, %v680_v35 }
 0x26f   : > { %1947 = vst.msk [vmem:[%s3230_s26 + $0xb8] sm:$0xff] %vm1923_vm10, %v2644_v43  ;;  %2645 = vpow2.f32 %v1717_v29  ;;  %v683_v29 = vadd.f32 %v3292_v28, %v682_v24 }
 0x270   : > { %2647 = vrcp.f32 %v1819_v31  ;;  %v1423_v36 = vpop.xlane.xlu2 %1422  ;;  %v1319_v37 = vmul.f32 %v3363_v5, %v1251_v32  ;;  %vm747_vm11 = vcmp.gt.f32.partialorder %v681_v62, 0.0 }
 0x271   : > { %v1565_v39 = vadd.f32 %v3453_v1, %v1423_v36  ;;  %v812_v41 = vmul.f32 0.01, %v683_v29  ;;  %vm748_vm12 = vcmp.gt.f32.partialorder %v683_v29, 0.0 }
 0x272   : > { %v1463_v40 = vsel %vm419_vm0, %v1319_v37, 0.0 }
 0x273   : > { %v1629_v3 = vsub.f32 0.0, %v1565_v39  ;;  %v1153_v44 = vpop.f32.mrf.mxu2  ;;  %1464 = vadd.xlane.f32.xlu1 %v1463_v40  ;;  %v811_v40 = vmul.f32 0.01, %v681_v62  ;;  %v876_v48 = vsel %vm748_vm12, %v683_v29, %v812_v41 }
 0x274   : > { %v1154_v47 = vadd.f32 %v3351_v0, %v1153_v44 }
 0x275   : > { %v2646_v50 = vpop.eup %2645  ;;  %v1719_v8 = vmul.f32 1.442695, %v1629_v3 }
 0x276   : > { %v2648_v51 = vpop.eup %2647  ;;  %v1820_v38 = vadd.f32 1.0, %v2646_v50  ;;  %v1252_v52 = vmax.f32 %v1154_v47, 0.0  ;;  %v875_v47 = vsel %vm747_vm11, %v681_v62, %v811_v40 }
 0x277   : > { %1948 = vst.msk [vmem:[%s3230_s26 + $0xc0] sm:$0xff] %vm1923_vm10, %v2648_v51  ;;  %2649 = vpow2.f32 %v1719_v8 }
 0x278   : > { %2651 = vrcp.f32 %v1820_v38  ;;  %2420 = vmatmul.msk.bf16.gmra.mxu2 %vm945_vm3, %v906_v19  ;;  %v1426_v53 = vpop.xlane.xlu0 %1425  ;;  %v1320_v54 = vmul.f32 %v3363_v5, %v1252_v52 }
 0x279   : > { %v1566_v55 = vadd.f32 %v3453_v1, %v1426_v53  ;;  %v908_v53 = vpack.c.bf16 %v876_v48, %v875_v47 }
 0x27a   : > { %v1466_v56 = vsel %vm419_vm0, %v1320_v54, 0.0 }
 0x27b   : > { %v1630_v46 = vsub.f32 0.0, %v1566_v55  ;;  %v1156_v18 = vpop.f32.mrf.mxu2  ;;  %1467 = vadd.xlane.f32.xlu2 %v1466_v56 }
 0x27c   : > { %v1157_v57 = vadd.f32 %v3351_v0, %v1156_v18 }
 0x27d   : > { %v2650_v58 = vpop.eup %2649  ;;  %v1721_v60 = vmul.f32 1.442695, %v1630_v46 }
 0x27e   : > { %v2652_v59 = vpop.eup %2651  ;;  %v1821_v63 = vadd.f32 1.0, %v2650_v58  ;;  %v1253_v10 = vmax.f32 %v1157_v57, 0.0 }
 0x27f   : > { %1949 = vst.msk [vmem:[%s3230_s26 + $0xc8] sm:$0xff] %vm1923_vm10, %v2652_v59  ;;  %2653 = vpow2.f32 %v1721_v60 }
 0x280   : > { %2655 = vrcp.f32 %v1821_v63  ;;  %v1429_v4 = vpop.xlane.xlu1 %1428  ;;  %v1321_v6 = vmul.f32 %v3363_v5, %v1253_v10 }
 0x281   : > { %v1567_v7 = vadd.f32 %v3453_v1, %v1429_v4 }
 0x282   : > { %v1469_v9 = vsel %vm419_vm0, %v1321_v6, 0.0 }
 0x283   : > { %v1631_v13 = vsub.f32 0.0, %v1567_v7  ;;  %v1158_v27 = vpop.f32.mrf.mxu2  ;;  %1470 = vadd.xlane.f32.xlu0 %v1469_v9 }
 0x284   : > { %v1159_v45 = vadd.f32 %v3351_v0, %v1158_v27 }
 0x285   : > { %v2654_v14 = vpop.eup %2653  ;;  %v1723_v15 = vmul.f32 1.442695, %v1631_v13 }
 0x286   : > { %v2656_v17 = vpop.eup %2655  ;;  %v1822_v21 = vadd.f32 1.0, %v2654_v14  ;;  %v1254_v61 = vmax.f32 %v1159_v45, 0.0 }
 0x287   : > { %1950 = vst.msk [vmem:[%s3230_s26 + $0xd0] sm:$0xff] %vm1923_vm10, %v2656_v17  ;;  %2657 = vpow2.f32 %v1723_v15 }
 0x288   : > { %2659 = vrcp.f32 %v1822_v21  ;;  %2421 = vmatmul.msk.bf16.gmra.mxu2 %vm945_vm3, %v907_v20  ;;  %v1432_v25 = vpop.xlane.xlu2 %1431  ;;  %v1322_v22 = vmul.f32 %v3363_v5, %v1254_v61 }
 0x289   : > { %v1568_v26 = vadd.f32 %v3453_v1, %v1432_v25 }
 0x28a   : > { %v1472_v49 = vsel %vm419_vm0, %v1322_v22, 0.0 }
 0x28b   : > { %v1632_v43 = vsub.f32 0.0, %v1568_v26  ;;  %v1161_v31 = vpop.f32.mrf.mxu2  ;;  %1473 = vadd.xlane.f32.xlu1 %v1472_v49 }
 0x28c   : > { %v1162_v32 = vadd.f32 %v3351_v0, %v1161_v31 }
 0x28d   : > { %v2658_v33 = vpop.eup %2657  ;;  %v1725_v34 = vmul.f32 1.442695, %v1632_v43 }
 0x28e   : > { %v2660_v36 = vpop.eup %2659  ;;  %v1823_v37 = vadd.f32 1.0, %v2658_v33  ;;  %v1255_v39 = vmax.f32 %v1162_v32, 0.0 }
 0x28f   : > { %1951 = vst.msk [vmem:[%s3230_s26 + $0xd8] sm:$0xff] %vm1923_vm10, %v2660_v36  ;;  %2661 = vpow2.f32 %v1725_v34 }
 0x290   : > { %2663 = vrcp.f32 %v1823_v37  ;;  %v1435_v42 = vpop.xlane.xlu0 %1434  ;;  %v1323_v28 = vmul.f32 %v3363_v5, %v1255_v39 }
 0x291   : > { %v1569_v3 = vadd.f32 %v3453_v1, %v1435_v42 }
 0x292   : > { %v1475_v44 = vsel %vm419_vm0, %v1323_v28, 0.0 }
 0x293   : > { %v1633_v50 = vsub.f32 0.0, %v1569_v3  ;;  %v1163_v8 = vpop.f32.mrf.mxu2  ;;  %1476 = vadd.xlane.f32.xlu2 %v1475_v44 }
 0x294   : > { %v1164_v51 = vadd.f32 %v3351_v0, %v1163_v8 }
 0x295   : > { %v2662_v19 = vpop.eup %2661  ;;  %v1727_v38 = vmul.f32 1.442695, %v1633_v50 }
 0x296   : > { %v2664_v52 = vpop.eup %2663  ;;  %v1824_v54 = vadd.f32 1.0, %v2662_v19  ;;  %v1256_v55 = vmax.f32 %v1164_v51, 0.0 }
 0x297   : > { %1952 = vst.msk [vmem:[%s3230_s26 + $0xe0] sm:$0xff] %vm1923_vm10, %v2664_v52  ;;  %2665 = vpow2.f32 %v1727_v38 }
 0x298   : > { %2667 = vrcp.f32 %v1824_v54  ;;  %2422 = vmatmul.msk.bf16.gmra.mxu2 %vm945_vm3, %v908_v53  ;;  %v1438_v56 = vpop.xlane.xlu1 %1437  ;;  %v1324_v16 = vmul.f32 %v3363_v5, %v1256_v55 }
 0x299   : > { %v1570_v23 = vadd.f32 %v3453_v1, %v1438_v56 }
 0x29a   : > { %v1478_v46 = vsel %vm419_vm0, %v1324_v16, 0.0 }
 0x29b   : > { %v1634_v18 = vsub.f32 0.0, %v1570_v23  ;;  %v1166_v57 = vpop.f32.mrf.mxu2  ;;  %1479 = vadd.xlane.f32.xlu0 %v1478_v46 }
 0x29c   : > { %v1167_v58 = vadd.f32 %v3351_v0, %v1166_v57 }
 0x29d   : > { %v2666_v60 = vpop.eup %2665  ;;  %v1729_v59 = vmul.f32 1.442695, %v1634_v18 }
 0x29e   : > { %v2668_v63 = vpop.eup %2667  ;;  %v1825_v10 = vadd.f32 1.0, %v2666_v60  ;;  %v1257_v35 = vmax.f32 %v1167_v58, 0.0 }
 0x29f   : > { %1953 = vst.msk [vmem:[%s3230_s26 + $0xe8] sm:$0xff] %vm1923_vm10, %v2668_v63  ;;  %2669 = vpow2.f32 %v1729_v59 }
 0x2a0   : > { %2671 = vrcp.f32 %v1825_v10  ;;  %v1325_v30 = vmul.f32 %v3363_v5, %v1257_v35 }
 0x2a2   : > { %v1481_v2 = vsel %vm419_vm0, %v1325_v30, 0.0 }
 0x2a3   : > { %v1168_v4 = vpop.f32.mrf.mxu2  ;;  %1482 = vadd.xlane.f32.xlu1 %v1481_v2 }
 0x2a4   : > { %v1169_v6 = vadd.f32 %v3351_v0, %v1168_v4 }
 0x2a5   : > { %v2670_v7 = vpop.eup %2669 }
 0x2a6   : > { %v2672_v9 = vpop.eup %2671  ;;  %v1826_v11 = vadd.f32 1.0, %v2670_v7  ;;  %v1258_v12 = vmax.f32 %v1169_v6, 0.0  ;;  %v1441_v13 = vpop.xlane.xlu2 %1440 }
 0x2a7   : > { %1954 = vst.msk [vmem:[%s3230_s26 + $0xf0] sm:$0xff] %vm1923_vm10, %v2672_v9  ;;  %v1571_v27 = vadd.f32 %v3453_v1, %v1441_v13 }
 0x2a8   : > { %2673 = vrcp.f32 %v1826_v11  ;;  %v1326_v45 = vmul.f32 %v3363_v5, %v1258_v12 }
 0x2a9   : > { %v1635_v14 = vsub.f32 0.0, %v1571_v27 }
 0x2aa   : > { %v1484_v15 = vsel %vm419_vm0, %v1326_v45, 0.0 }
 0x2ab   : > { %v1731_v17 = vmul.f32 1.442695, %v1635_v14  ;;  %v1171_v20 = vpop.f32.mrf.mxu2  ;;  %1485 = vadd.xlane.f32.xlu2 %v1484_v15 }
 0x2ac   : > { %v1172_v21 = vadd.f32 %v3351_v0, %v1171_v20 }
 0x2ad   : > { %2675 = vpow2.f32 %v1731_v17 }
 0x2ae   : > { %v2674_v61 = vpop.eup %2673  ;;  %v1259_v24 = vmax.f32 %v1172_v21, 0.0  ;;  %v1444_v25 = vpop.xlane.xlu0 %1443 }
 0x2af   : > { %1955 = vst.msk [vmem:[%s3230_s26 + $0xf8] sm:$0xff] %vm1923_vm10, %v2674_v61  ;;  %v1572_v22 = vadd.f32 %v3453_v1, %v1444_v25 }
 0x2b0   : > { %v1327_v26 = vmul.f32 %v3363_v5, %v1259_v24 }
 0x2b1   : > { %v1636_v49 = vsub.f32 0.0, %v1572_v22 }
 0x2b2   : > { %v1487_v62 = vsel %vm419_vm0, %v1327_v26, 0.0 }
 0x2b3   : > { %v2676_v29 = vpop.eup %2675  ;;  %v1733_v43 = vmul.f32 1.442695, %v1636_v49  ;;  %v1173_v31 = vpop.f32.mrf.mxu2  ;;  %1488 = vadd.xlane.f32.xlu0 %v1487_v62 }
 0x2b4   : > { %v1827_v32 = vadd.f32 1.0, %v2676_v29  ;;  %v1174_v33 = vadd.f32 %v3351_v0, %v1173_v31  ;;  %v3566_v31 = vld [vmem:[%s3832_s4] ss:$0 sm:$0xff] }
 0x2b5   : > { %2677 = vpow2.f32 %v1733_v43 }
 0x2b6   : > { %2679 = vrcp.f32 %v1827_v32  ;;  %v1260_v34 = vmax.f32 %v1174_v33, 0.0  ;;  %v1447_v36 = vpop.xlane.xlu1 %1446 }
 0x2b7   : > { %v1573_v37 = vadd.f32 %v3453_v1, %v1447_v36  ;;  %v3575_v36 = vld [vmem:[%s3833_s5] ss:$0 sm:$0xff] }
 0x2b8   : > { %v1328_v39 = vmul.f32 %v3363_v5, %v1260_v34 }
 0x2b9   : > { %v1637_v40 = vsub.f32 0.0, %v1573_v37 }
 0x2ba   : > { %v1490_v41 = vsel %vm419_vm0, %v1328_v39, 0.0 }
 0x2bb   : > { %v2678_v42 = vpop.eup %2677  ;;  %v1735_v28 = vmul.f32 1.442695, %v1637_v40  ;;  %v1176_v3 = vpop.f32.mrf.mxu2  ;;  %1491 = vadd.xlane.f32.xlu1 %v1490_v41 }
 0x2bc   : > { %v2680_v44 = vpop.eup %2679  ;;  %v1828_v47 = vadd.f32 1.0, %v2678_v42  ;;  %v1177_v48 = vadd.f32 %v3351_v0, %v1176_v3 }
 0x2bd   : > { %1956 = vst.msk [vmem:[%s3230_s26 + $0x100] sm:$0xff] %vm1923_vm10, %v2680_v44  ;;  %2681 = vpow2.f32 %v1735_v28 }
 0x2be   : > { %2683 = vrcp.f32 %v1828_v47  ;;  %v1261_v50 = vmax.f32 %v1177_v48, 0.0  ;;  %v1450_v8 = vpop.xlane.xlu2 %1449 }
 0x2bf   : > { %v1574_v51 = vadd.f32 %v3453_v1, %v1450_v8 }
 0x2c0   : > { %v1329_v19 = vmul.f32 %v3363_v5, %v1261_v50 }
 0x2c1   : > { %v1638_v38 = vsub.f32 0.0, %v1574_v51 }
 0x2c2   : > { %v1493_v52 = vsel %vm419_vm0, %v1329_v19, 0.0 }
 0x2c3   : > { %v2682_v53 = vpop.eup %2681  ;;  %v1737_v54 = vmul.f32 1.442695, %v1638_v38  ;;  %v1178_v55 = vpop.f32.mrf.mxu2  ;;  %1494 = vadd.xlane.f32.xlu2 %v1493_v52 }
 0x2c4   : > { %v2684_v56 = vpop.eup %2683  ;;  %v1829_v16 = vadd.f32 1.0, %v2682_v53  ;;  %v1179_v23 = vadd.f32 %v3351_v0, %v1178_v55 }
 0x2c5   : > { %1957 = vst.msk [vmem:[%s3230_s26 + $0x108] sm:$0xff] %vm1923_vm10, %v2684_v56  ;;  %2685 = vpow2.f32 %v1737_v54 }
 0x2c6   : > { %2687 = vrcp.f32 %v1829_v16  ;;  %v1262_v46 = vmax.f32 %v1179_v23, 0.0  ;;  %v1453_v18 = vpop.xlane.xlu0 %1452 }
 0x2c7   : > { %v1575_v57 = vadd.f32 %v3453_v1, %v1453_v18 }
 0x2c8   : > { %v1330_v58 = vmul.f32 %v3363_v5, %v1262_v46 }
 0x2c9   : > { %v1639_v60 = vsub.f32 0.0, %v1575_v57 }
 0x2ca   : > { %v1496_v59 = vsel %vm419_vm0, %v1330_v58, 0.0 }
 0x2cb   : > { %v2686_v63 = vpop.eup %2685  ;;  %v1739_v10 = vmul.f32 1.442695, %v1639_v60  ;;  %v1181_v35 = vpop.f32.mrf.mxu2  ;;  %1497 = vadd.xlane.f32.xlu0 %v1496_v59 }
 0x2cc   : > { %v2688_v30 = vpop.eup %2687  ;;  %v1830_v2 = vadd.f32 1.0, %v2686_v63  ;;  %v1182_v4 = vadd.f32 %v3351_v0, %v1181_v35 }
 0x2cd   : > { %1958 = vst.msk [vmem:[%s3230_s26 + $0x110] sm:$0xff] %vm1923_vm10, %v2688_v30  ;;  %2689 = vpow2.f32 %v1739_v10 }
 0x2ce   : > { %2691 = vrcp.f32 %v1830_v2  ;;  %v1263_v6 = vmax.f32 %v1182_v4, 0.0  ;;  %v1456_v7 = vpop.xlane.xlu1 %1455 }
 0x2cf   : > { %v1576_v9 = vadd.f32 %v3453_v1, %v1456_v7 }
 0x2d0   : > { %v1331_v11 = vmul.f32 %v3363_v5, %v1263_v6 }
 0x2d1   : > { %v1640_v12 = vsub.f32 0.0, %v1576_v9 }
 0x2d2   : > { %v1499_v13 = vsel %vm419_vm0, %v1331_v11, 0.0 }
 0x2d3   : > { %v2690_v27 = vpop.eup %2689  ;;  %v1741_v45 = vmul.f32 1.442695, %v1640_v12  ;;  %v1183_v14 = vpop.f32.mrf.mxu2  ;;  %1500 = vadd.xlane.f32.xlu1 %v1499_v13 }
 0x2d4   : > { %v2692_v15 = vpop.eup %2691  ;;  %v1831_v17 = vadd.f32 1.0, %v2690_v27  ;;  %v1184_v20 = vadd.f32 %v3351_v0, %v1183_v14 }
 0x2d5   : > { %1959 = vst.msk [vmem:[%s3230_s26 + $0x118] sm:$0xff] %vm1923_vm10, %v2692_v15  ;;  %2693 = vpow2.f32 %v1741_v45 }
 0x2d6   : > { %2695 = vrcp.f32 %v1831_v17  ;;  %v1264_v21 = vmax.f32 %v1184_v20, 0.0  ;;  %v1459_v61 = vpop.xlane.xlu2 %1458 }
 0x2d7   : > { %v1577_v24 = vadd.f32 %v3453_v1, %v1459_v61 }
 0x2d8   : > { %v1332_v25 = vmul.f32 %v3363_v5, %v1264_v21 }
 0x2d9   : > { %v1641_v22 = vsub.f32 0.0, %v1577_v24 }
 0x2da   : > { %v1502_v26 = vsel %vm419_vm0, %v1332_v25, 0.0 }
 0x2db   : > { %v2694_v49 = vpop.eup %2693  ;;  %v1743_v62 = vmul.f32 1.442695, %v1641_v22  ;;  %v1186_v29 = vpop.f32.mrf.mxu2  ;;  %1503 = vadd.xlane.f32.xlu2 %v1502_v26 }
 0x2dc   : > { %v2696_v43 = vpop.eup %2695  ;;  %v1832_v0 = vadd.f32 1.0, %v2694_v49  ;;  %v1187_v32 = vadd.f32 %v3566_v31, %v1186_v29 }
 0x2dd   : > { %1960 = vst.msk [vmem:[%s3230_s26 + $0x120] sm:$0xff] %vm1923_vm10, %v2696_v43  ;;  %2697 = vpow2.f32 %v1743_v62 }
 0x2de   : > { %2699 = vrcp.f32 %v1832_v0  ;;  %v1265_v5 = vmax.f32 %v1187_v32, 0.0  ;;  %v1462_v33 = vpop.xlane.xlu0 %1461 }
 0x2df   : > { %v1578_v34 = vadd.f32 %v3453_v1, %v1462_v33 }
 0x2e0   : > { %v1333_v37 = vmul.f32 %v3575_v36, %v1265_v5 }
 0x2e1   : > { %v1642_v39 = vsub.f32 0.0, %v1578_v34 }
 0x2e2   : > { %v1505_v40 = vsel %vm419_vm0, %v1333_v37, 0.0 }
 0x2e3   : > { %v2698_v41 = vpop.eup %2697  ;;  %v1745_v42 = vmul.f32 1.442695, %v1642_v39  ;;  %v1188_v28 = vpop.f32.mrf.mxu2  ;;  %1506 = vadd.xlane.f32.xlu0 %v1505_v40 }
 0x2e4   : > { %v2700_v3 = vpop.eup %2699  ;;  %v1833_v44 = vadd.f32 1.0, %v2698_v41  ;;  %v1189_v47 = vadd.f32 %v3566_v31, %v1188_v28 }
 0x2e5   : > { %1961 = vst.msk [vmem:[%s3230_s26 + $0x128] sm:$0xff] %vm1923_vm10, %v2700_v3  ;;  %2701 = vpow2.f32 %v1745_v42 }
 0x2e6   : > { %2703 = vrcp.f32 %v1833_v44  ;;  %v1266_v48 = vmax.f32 %v1189_v47, 0.0  ;;  %v1465_v50 = vpop.xlane.xlu1 %1464 }
 0x2e7   : > { %v1579_v8 = vadd.f32 %v3453_v1, %v1465_v50 }
 0x2e8   : > { %v1334_v51 = vmul.f32 %v3575_v36, %v1266_v48 }
 0x2e9   : > { %v1643_v19 = vsub.f32 0.0, %v1579_v8 }
 0x2ea   : > { %v1508_v38 = vsel %vm419_vm0, %v1334_v51, 0.0 }
 0x2eb   : > { %v2702_v52 = vpop.eup %2701  ;;  %v1747_v53 = vmul.f32 1.442695, %v1643_v19  ;;  %v1191_v54 = vpop.f32.mrf.mxu2  ;;  %1509 = vadd.xlane.f32.xlu1 %v1508_v38 }
 0x2ec   : > { %v2704_v55 = vpop.eup %2703  ;;  %v1834_v56 = vadd.f32 1.0, %v2702_v52  ;;  %v1192_v16 = vadd.f32 %v3566_v31, %v1191_v54 }
 0x2ed   : > { %1962 = vst.msk [vmem:[%s3230_s26 + $0x130] sm:$0xff] %vm1923_vm10, %v2704_v55  ;;  %2705 = vpow2.f32 %v1747_v53 }
 0x2ee   : > { %2707 = vrcp.f32 %v1834_v56  ;;  %v1267_v23 = vmax.f32 %v1192_v16, 0.0  ;;  %v1468_v46 = vpop.xlane.xlu2 %1467 }
 0x2ef   : > { %v1580_v18 = vadd.f32 %v3453_v1, %v1468_v46 }
 0x2f0   : > { %v1335_v57 = vmul.f32 %v3575_v36, %v1267_v23 }
 0x2f1   : > { %v1644_v58 = vsub.f32 0.0, %v1580_v18 }
 0x2f2   : > { %v1511_v60 = vsel %vm419_vm0, %v1335_v57, 0.0 }
 0x2f3   : > { %v2706_v59 = vpop.eup %2705  ;;  %v1749_v63 = vmul.f32 1.442695, %v1644_v58  ;;  %v1193_v10 = vpop.f32.mrf.mxu2  ;;  %1512 = vadd.xlane.f32.xlu2 %v1511_v60 }
 0x2f4   : > { %v2708_v35 = vpop.eup %2707  ;;  %v1835_v30 = vadd.f32 1.0, %v2706_v59  ;;  %v1194_v2 = vadd.f32 %v3566_v31, %v1193_v10 }
 0x2f5   : > { %1963 = vst.msk [vmem:[%s3230_s26 + $0x138] sm:$0xff] %vm1923_vm10, %v2708_v35  ;;  %2709 = vpow2.f32 %v1749_v63 }
 0x2f6   : > { %2711 = vrcp.f32 %v1835_v30  ;;  %v1268_v4 = vmax.f32 %v1194_v2, 0.0  ;;  %v1471_v6 = vpop.xlane.xlu0 %1470 }
 0x2f7   : > { %v1581_v7 = vadd.f32 %v3453_v1, %v1471_v6 }
 0x2f8   : > { %v1336_v9 = vmul.f32 %v3575_v36, %v1268_v4 }
 0x2f9   : > { %v1645_v11 = vsub.f32 0.0, %v1581_v7 }
 0x2fa   : > { %v1514_v12 = vsel %vm419_vm0, %v1336_v9, 0.0 }
 0x2fb   : > { %v2710_v13 = vpop.eup %2709  ;;  %v1751_v27 = vmul.f32 1.442695, %v1645_v11  ;;  %v1196_v45 = vpop.f32.mrf.mxu2  ;;  %1515 = vadd.xlane.f32.xlu0 %v1514_v12 }
 0x2fc   : > { %v2712_v14 = vpop.eup %2711  ;;  %v1836_v15 = vadd.f32 1.0, %v2710_v13  ;;  %v1197_v17 = vadd.f32 %v3566_v31, %v1196_v45 }
 0x2fd   : > { %1964 = vst.msk [vmem:[%s3230_s26 + $0x140] sm:$0xff] %vm1923_vm10, %v2712_v14  ;;  %2713 = vpow2.f32 %v1751_v27 }
 0x2fe   : > { %2715 = vrcp.f32 %v1836_v15  ;;  %v1269_v20 = vmax.f32 %v1197_v17, 0.0  ;;  %v1474_v21 = vpop.xlane.xlu1 %1473 }
 0x2ff   : > { %v1582_v61 = vadd.f32 %v3453_v1, %v1474_v21 }
 0x300   : > { %v1337_v24 = vmul.f32 %v3575_v36, %v1269_v20 }
 0x301   : > { %v1646_v25 = vsub.f32 0.0, %v1582_v61 }
 0x302   : > { %v1517_v22 = vsel %vm419_vm0, %v1337_v24, 0.0 }
 0x303   : > { %v2714_v26 = vpop.eup %2713  ;;  %v1753_v49 = vmul.f32 1.442695, %v1646_v25  ;;  %v1198_v62 = vpop.f32.mrf.mxu2  ;;  %1518 = vadd.xlane.f32.xlu1 %v1517_v22 }
 0x304   : > { %v2716_v29 = vpop.eup %2715  ;;  %v1837_v43 = vadd.f32 1.0, %v2714_v26  ;;  %v1199_v0 = vadd.f32 %v3566_v31, %v1198_v62 }
 0x305   : > { %1965 = vst.msk [vmem:[%s3230_s26 + $0x148] sm:$0xff] %vm1923_vm10, %v2716_v29  ;;  %2717 = vpow2.f32 %v1753_v49 }
 0x306   : > { %2719 = vrcp.f32 %v1837_v43  ;;  %v1270_v32 = vmax.f32 %v1199_v0, 0.0  ;;  %v1477_v5 = vpop.xlane.xlu2 %1476 }
 0x307   : > { %v1583_v33 = vadd.f32 %v3453_v1, %v1477_v5 }
 0x308   : > { %v1338_v34 = vmul.f32 %v3575_v36, %v1270_v32 }
 0x309   : > { %v1647_v37 = vsub.f32 0.0, %v1583_v33 }
 0x30a   : > { %v1520_v39 = vsel %vm419_vm0, %v1338_v34, 0.0 }
 0x30b   : > { %v2718_v40 = vpop.eup %2717  ;;  %v1755_v41 = vmul.f32 1.442695, %v1647_v37  ;;  %v1201_v42 = vpop.f32.mrf.mxu2  ;;  %1521 = vadd.xlane.f32.xlu2 %v1520_v39 }
 0x30c   : > { %v2720_v28 = vpop.eup %2719  ;;  %v1838_v3 = vadd.f32 1.0, %v2718_v40  ;;  %v1202_v44 = vadd.f32 %v3566_v31, %v1201_v42 }
 0x30d   : > { %1966 = vst.msk [vmem:[%s3230_s26 + $0x150] sm:$0xff] %vm1923_vm10, %v2720_v28  ;;  %2721 = vpow2.f32 %v1755_v41 }
 0x30e   : > { %2723 = vrcp.f32 %v1838_v3  ;;  %v1271_v47 = vmax.f32 %v1202_v44, 0.0  ;;  %v1480_v48 = vpop.xlane.xlu0 %1479 }
 0x30f   : > { %v1584_v50 = vadd.f32 %v3453_v1, %v1480_v48 }
 0x310   : > { %v1339_v8 = vmul.f32 %v3575_v36, %v1271_v47 }
 0x311   : > { %v1648_v51 = vsub.f32 0.0, %v1584_v50 }
 0x312   : > { %v1523_v19 = vsel %vm419_vm0, %v1339_v8, 0.0 }
 0x313   : > { %v2722_v38 = vpop.eup %2721  ;;  %v1757_v52 = vmul.f32 1.442695, %v1648_v51  ;;  %v1203_v53 = vpop.f32.mrf.mxu2  ;;  %1524 = vadd.xlane.f32.xlu0 %v1523_v19 }
 0x314   : > { %v2724_v54 = vpop.eup %2723  ;;  %v1839_v55 = vadd.f32 1.0, %v2722_v38  ;;  %v1204_v56 = vadd.f32 %v3566_v31, %v1203_v53 }
 0x315   : > { %1967 = vst.msk [vmem:[%s3230_s26 + $0x158] sm:$0xff] %vm1923_vm10, %v2724_v54  ;;  %2725 = vpow2.f32 %v1757_v52 }
 0x316   : > { %2727 = vrcp.f32 %v1839_v55  ;;  %v1272_v16 = vmax.f32 %v1204_v56, 0.0  ;;  %v1483_v23 = vpop.xlane.xlu1 %1482 }
 0x317   : > { %v1585_v46 = vadd.f32 %v3453_v1, %v1483_v23 }
 0x318   : > { %v1340_v18 = vmul.f32 %v3575_v36, %v1272_v16 }
 0x319   : > { %v1649_v57 = vsub.f32 0.0, %v1585_v46 }
 0x31a   : > { %v1526_v58 = vsel %vm419_vm0, %v1340_v18, 0.0 }
 0x31b   : > { %v2726_v60 = vpop.eup %2725  ;;  %v1759_v59 = vmul.f32 1.442695, %v1649_v57  ;;  %v1206_v63 = vpop.f32.mrf.mxu2  ;;  %1527 = vadd.xlane.f32.xlu1 %v1526_v58 }
 0x31c   : > { %v2728_v10 = vpop.eup %2727  ;;  %v1840_v35 = vadd.f32 1.0, %v2726_v60  ;;  %v1207_v30 = vadd.f32 %v3566_v31, %v1206_v63 }
 0x31d   : > { %1968 = vst.msk [vmem:[%s3230_s26 + $0x160] sm:$0xff] %vm1923_vm10, %v2728_v10  ;;  %2729 = vpow2.f32 %v1759_v59  ;;  %v3650_v59 = vld [vmem:[#allocation2] ss:$0 sm:$0xff] }
 0x31e   : > { %2731 = vrcp.f32 %v1840_v35  ;;  %v1273_v2 = vmax.f32 %v1207_v30, 0.0  ;;  %v1486_v4 = vpop.xlane.xlu2 %1485 }
 0x31f   : > { %v1586_v6 = vadd.f32 %v3453_v1, %v1486_v4 }
 0x320   : > { %v1341_v7 = vmul.f32 %v3575_v36, %v1273_v2 }
 0x321   : > { %v1650_v9 = vsub.f32 0.0, %v1586_v6 }
 0x322   : > { %v1529_v11 = vsel %vm419_vm0, %v1341_v7, 0.0 }
 0x323   : > { %v2730_v12 = vpop.eup %2729  ;;  %v1761_v13 = vmul.f32 1.442695, %v1650_v9  ;;  %v1208_v27 = vpop.f32.mrf.mxu2  ;;  %1530 = vadd.xlane.f32.xlu2 %v1529_v11 }
 0x324   : > { %v2732_v45 = vpop.eup %2731  ;;  %v1841_v14 = vadd.f32 1.0, %v2730_v12  ;;  %v1209_v15 = vadd.f32 %v3566_v31, %v1208_v27 }
 0x325   : > { %1969 = vst.msk [vmem:[%s3230_s26 + $0x168] sm:$0xff] %vm1923_vm10, %v2732_v45  ;;  %2733 = vpow2.f32 %v1761_v13 }
 0x326   : > { %2735 = vrcp.f32 %v1841_v14  ;;  %v1274_v17 = vmax.f32 %v1209_v15, 0.0  ;;  %v1489_v20 = vpop.xlane.xlu0 %1488 }
 0x327   : > { %v1587_v21 = vadd.f32 %v3453_v1, %v1489_v20 }
 0x328   : > { %v1342_v61 = vmul.f32 %v3575_v36, %v1274_v17 }
 0x329   : > { %v1651_v24 = vsub.f32 0.0, %v1587_v21 }
 0x32a   : > { %v1532_v25 = vsel %vm419_vm0, %v1342_v61, 0.0 }
 0x32b   : > { %v2734_v22 = vpop.eup %2733  ;;  %v1763_v26 = vmul.f32 1.442695, %v1651_v24  ;;  %1533 = vadd.xlane.f32.xlu0 %v1532_v25 }
 0x32c   : > { %v2736_v49 = vpop.eup %2735  ;;  %v1842_v62 = vadd.f32 1.0, %v2734_v22 }
 0x32d   : > { %1970 = vst.msk [vmem:[%s3230_s26 + $0x170] sm:$0xff] %vm1923_vm10, %v2736_v49  ;;  %2737 = vpow2.f32 %v1763_v26 }
 0x32e   : > { %2739 = vrcp.f32 %v1842_v62  ;;  %v1492_v31 = vpop.xlane.xlu1 %1491 }
 0x32f   : > { %v1588_v29 = vadd.f32 %v3453_v1, %v1492_v31 }
 0x331   : > { %v1652_v43 = vsub.f32 0.0, %v1588_v29 }
 0x333   : > { %v2738_v0 = vpop.eup %2737  ;;  %v1765_v36 = vmul.f32 1.442695, %v1652_v43 }
 0x334   : > { %v2740_v32 = vpop.eup %2739  ;;  %v1843_v5 = vadd.f32 1.0, %v2738_v0 }
 0x335   : > { %1971 = vst.msk [vmem:[%s3230_s26 + $0x178] sm:$0xff] %vm1923_vm10, %v2740_v32  ;;  %2741 = vpow2.f32 %v1765_v36 }
 0x336   : > { %2743 = vrcp.f32 %v1843_v5  ;;  %v1495_v33 = vpop.xlane.xlu2 %1494 }
 0x337   : > { %v1589_v34 = vadd.f32 %v3453_v1, %v1495_v33 }
 0x339   : > { %v1653_v37 = vsub.f32 0.0, %v1589_v34 }
 0x33b   : > { %v2742_v39 = vpop.eup %2741  ;;  %v1767_v40 = vmul.f32 1.442695, %v1653_v37 }
 0x33c   : > { %v2744_v41 = vpop.eup %2743  ;;  %v1844_v42 = vadd.f32 1.0, %v2742_v39 }
 0x33d   : > { %1972 = vst.msk [vmem:[%s3230_s26 + $0x180] sm:$0xff] %vm1923_vm10, %v2744_v41  ;;  %2745 = vpow2.f32 %v1767_v40 }
 0x33e   : > { %2747 = vrcp.f32 %v1844_v42  ;;  %v1498_v28 = vpop.xlane.xlu0 %1497 }
 0x33f   : > { %v1590_v3 = vadd.f32 %v3453_v1, %v1498_v28 }
 0x341   : > { %v1654_v44 = vsub.f32 0.0, %v1590_v3 }
 0x343   : > { %v2746_v47 = vpop.eup %2745  ;;  %v1769_v48 = vmul.f32 1.442695, %v1654_v44 }
 0x344   : > { %v2748_v50 = vpop.eup %2747  ;;  %v1845_v8 = vadd.f32 1.0, %v2746_v47 }
 0x345   : > { %1973 = vst.msk [vmem:[%s3230_s26 + $0x188] sm:$0xff] %vm1923_vm10, %v2748_v50  ;;  %2749 = vpow2.f32 %v1769_v48 }
 0x346   : > { %2751 = vrcp.f32 %v1845_v8  ;;  %v1501_v51 = vpop.xlane.xlu1 %1500 }
 0x347   : > { %v1591_v19 = vadd.f32 %v3453_v1, %v1501_v51 }
 0x349   : > { %v1655_v38 = vsub.f32 0.0, %v1591_v19 }
 0x34b   : > { %v2750_v52 = vpop.eup %2749  ;;  %v1771_v53 = vmul.f32 1.442695, %v1655_v38 }
 0x34c   : > { %v2752_v54 = vpop.eup %2751  ;;  %v1846_v55 = vadd.f32 1.0, %v2750_v52 }
 0x34d   : > { %1974 = vst.msk [vmem:[%s3230_s26 + $0x190] sm:$0xff] %vm1923_vm10, %v2752_v54  ;;  %2753 = vpow2.f32 %v1771_v53 }
 0x34e   : > { %2755 = vrcp.f32 %v1846_v55  ;;  %v1504_v56 = vpop.xlane.xlu2 %1503 }
 0x34f   : > { %v1592_v16 = vadd.f32 %v3453_v1, %v1504_v56 }
 0x351   : > { %v1656_v23 = vsub.f32 0.0, %v1592_v16 }
 0x353   : > { %v2754_v46 = vpop.eup %2753  ;;  %v1773_v18 = vmul.f32 1.442695, %v1656_v23 }
 0x354   : > { %v2756_v57 = vpop.eup %2755  ;;  %v1847_v58 = vadd.f32 1.0, %v2754_v46 }
 0x355   : > { %1975 = vst.msk [vmem:[%s3230_s26 + $0x198] sm:$0xff] %vm1923_vm10, %v2756_v57  ;;  %2757 = vpow2.f32 %v1773_v18 }
 0x356   : > { %2759 = vrcp.f32 %v1847_v58  ;;  %v1507_v60 = vpop.xlane.xlu0 %1506 }
 0x357   : > { %v1593_v63 = vadd.f32 %v3650_v59, %v1507_v60 }
 0x359   : > { %v1657_v10 = vsub.f32 0.0, %v1593_v63 }
 0x35b   : > { %v2758_v35 = vpop.eup %2757  ;;  %v1775_v30 = vmul.f32 1.442695, %v1657_v10 }
 0x35c   : > { %v2760_v1 = vpop.eup %2759  ;;  %v1848_v2 = vadd.f32 1.0, %v2758_v35 }
 0x35d   : > { %1976 = vst.msk [vmem:[%s3230_s26 + $0x1a0] sm:$0xff] %vm1923_vm10, %v2760_v1  ;;  %2761 = vpow2.f32 %v1775_v30 }
 0x35e   : > { %2763 = vrcp.f32 %v1848_v2  ;;  %v1510_v4 = vpop.xlane.xlu1 %1509 }
 0x35f   : > { %v1594_v6 = vadd.f32 %v3650_v59, %v1510_v4 }
 0x361   : > { %v1658_v7 = vsub.f32 0.0, %v1594_v6 }
 0x363   : > { %v2762_v9 = vpop.eup %2761  ;;  %v1777_v11 = vmul.f32 1.442695, %v1658_v7 }
 0x364   : > { %v2764_v12 = vpop.eup %2763  ;;  %v1849_v13 = vadd.f32 1.0, %v2762_v9 }
 0x365   : > { %1977 = vst.msk [vmem:[%s3230_s26 + $0x1a8] sm:$0xff] %vm1923_vm10, %v2764_v12  ;;  %2765 = vpow2.f32 %v1777_v11 }
 0x366   : > { %2767 = vrcp.f32 %v1849_v13  ;;  %v1513_v27 = vpop.xlane.xlu2 %1512 }
 0x367   : > { %v1595_v45 = vadd.f32 %v3650_v59, %v1513_v27 }
 0x369   : > { %v1659_v14 = vsub.f32 0.0, %v1595_v45 }
 0x36b   : > { %v2766_v15 = vpop.eup %2765  ;;  %v1779_v17 = vmul.f32 1.442695, %v1659_v14 }
 0x36c   : > { %v2768_v20 = vpop.eup %2767  ;;  %v1850_v21 = vadd.f32 1.0, %v2766_v15 }
 0x36d   : > { %1978 = vst.msk [vmem:[%s3230_s26 + $0x1b0] sm:$0xff] %vm1923_vm10, %v2768_v20  ;;  %2769 = vpow2.f32 %v1779_v17 }
 0x36e   : > { %2771 = vrcp.f32 %v1850_v21  ;;  %v1516_v61 = vpop.xlane.xlu0 %1515 }
 0x36f   : > { %v1596_v24 = vadd.f32 %v3650_v59, %v1516_v61 }
 0x371   : > { %v1660_v25 = vsub.f32 0.0, %v1596_v24 }
 0x373   : > { %v2770_v22 = vpop.eup %2769  ;;  %v1781_v26 = vmul.f32 1.442695, %v1660_v25 }
 0x374   : > { %v2772_v49 = vpop.eup %2771  ;;  %v1851_v62 = vadd.f32 1.0, %v2770_v22 }
 0x375   : > { %1979 = vst.msk [vmem:[%s3230_s26 + $0x1b8] sm:$0xff] %vm1923_vm10, %v2772_v49  ;;  %2773 = vpow2.f32 %v1781_v26 }
 0x376   : > { %2775 = vrcp.f32 %v1851_v62  ;;  %v1519_v31 = vpop.xlane.xlu1 %1518 }
 0x377   : > { %v1597_v29 = vadd.f32 %v3650_v59, %v1519_v31 }
 0x379   : > { %v1661_v43 = vsub.f32 0.0, %v1597_v29 }
 0x37b   : > { %v2774_v0 = vpop.eup %2773  ;;  %v1783_v36 = vmul.f32 1.442695, %v1661_v43 }
 0x37c   : > { %v2776_v32 = vpop.eup %2775  ;;  %v1852_v5 = vadd.f32 1.0, %v2774_v0 }
 0x37d   : > { %1980 = vst.msk [vmem:[%s3230_s26 + $0x1c0] sm:$0xff] %vm1923_vm10, %v2776_v32  ;;  %2777 = vpow2.f32 %v1783_v36 }
 0x37e   : > { %2779 = vrcp.f32 %v1852_v5  ;;  %v1522_v33 = vpop.xlane.xlu2 %1521 }
 0x37f   : > { %v1598_v34 = vadd.f32 %v3650_v59, %v1522_v33 }
 0x381   : > { %v1662_v37 = vsub.f32 0.0, %v1598_v34 }
 0x383   : > { %v2778_v39 = vpop.eup %2777  ;;  %v1785_v40 = vmul.f32 1.442695, %v1662_v37 }
 0x384   : > { %v2780_v41 = vpop.eup %2779  ;;  %v1853_v42 = vadd.f32 1.0, %v2778_v39 }
 0x385   : > { %1981 = vst.msk [vmem:[%s3230_s26 + $0x1c8] sm:$0xff] %vm1923_vm10, %v2780_v41  ;;  %2781 = vpow2.f32 %v1785_v40 }
 0x386   : > { %2783 = vrcp.f32 %v1853_v42  ;;  %v1525_v28 = vpop.xlane.xlu0 %1524 }
 0x387   : > { %v1599_v3 = vadd.f32 %v3650_v59, %v1525_v28 }
 0x389   : > { %v1663_v44 = vsub.f32 0.0, %v1599_v3 }
 0x38b   : > { %v2782_v47 = vpop.eup %2781  ;;  %v1787_v48 = vmul.f32 1.442695, %v1663_v44 }
 0x38c   : > { %v2784_v50 = vpop.eup %2783  ;;  %v1854_v8 = vadd.f32 1.0, %v2782_v47 }
 0x38d   : > { %1982 = vst.msk [vmem:[%s3230_s26 + $0x1d0] sm:$0xff] %vm1923_vm10, %v2784_v50  ;;  %2785 = vpow2.f32 %v1787_v48 }
 0x38e   : > { %2787 = vrcp.f32 %v1854_v8  ;;  %v1528_v51 = vpop.xlane.xlu1 %1527 }
 0x38f   : > { %v1600_v19 = vadd.f32 %v3650_v59, %v1528_v51 }
 0x391   : > { %v1664_v38 = vsub.f32 0.0, %v1600_v19 }
 0x393   : > { %v2786_v52 = vpop.eup %2785  ;;  %v1789_v53 = vmul.f32 1.442695, %v1664_v38 }
 0x394   : > { %v2788_v54 = vpop.eup %2787  ;;  %v1855_v55 = vadd.f32 1.0, %v2786_v52 }
 0x395   : > { %1983 = vst.msk [vmem:[%s3230_s26 + $0x1d8] sm:$0xff] %vm1923_vm10, %v2788_v54  ;;  %2789 = vpow2.f32 %v1789_v53 }
 0x396   : > { %2791 = vrcp.f32 %v1855_v55  ;;  %v1531_v56 = vpop.xlane.xlu2 %1530 }
 0x397   : > { %v1601_v16 = vadd.f32 %v3650_v59, %v1531_v56 }
 0x399   : > { %v1665_v23 = vsub.f32 0.0, %v1601_v16 }
 0x39b   : > { %v2790_v46 = vpop.eup %2789  ;;  %v1791_v18 = vmul.f32 1.442695, %v1665_v23 }
 0x39c   : > { %v2792_v57 = vpop.eup %2791  ;;  %v1856_v58 = vadd.f32 1.0, %v2790_v46 }
 0x39d   : > { %1984 = vst.msk [vmem:[%s3230_s26 + $0x1e0] sm:$0xff] %vm1923_vm10, %v2792_v57  ;;  %2793 = vpow2.f32 %v1791_v18 }
 0x39e   : > { %2795 = vrcp.f32 %v1856_v58  ;;  %v1534_v60 = vpop.xlane.xlu0 %1533 }
 0x39f   : > { %v1602_v63 = vadd.f32 %v3650_v59, %v1534_v60 }
 0x3a1   : > { %v1666_v10 = vsub.f32 0.0, %v1602_v63 }
 0x3a3   : > { %v2794_v35 = vpop.eup %2793  ;;  %v1793_v30 = vmul.f32 1.442695, %v1666_v10 }
 0x3a4   : > { %v2796_v1 = vpop.eup %2795  ;;  %v1857_v2 = vadd.f32 1.0, %v2794_v35 }
 0x3a5   : > { %1985 = vst.msk [vmem:[%s3230_s26 + $0x1e8] sm:$0xff] %vm1923_vm10, %v2796_v1  ;;  %2797 = vpow2.f32 %v1793_v30 }
 0x3a6   : > { %2799 = vrcp.f32 %v1857_v2 }
 0x3ab   : > { %v2798_v4 = vpop.eup %2797 }
 0x3ac   : > { %v2800_v6 = vpop.eup %2799  ;;  %v1858_v7 = vadd.f32 1.0, %v2798_v4 }
 0x3ad   : > { %1986 = vst.msk [vmem:[%s3230_s26 + $0x1f0] sm:$0xff] %vm1923_vm10, %v2800_v6 }
 0x3ae   : > { %2801 = vrcp.f32 %v1858_v7 }
 0x3b1   : > { %1994 = sbr.rel (!%p2966_p4) target bundleno = 1014 (0x3f6), region = 52 }
 0x3b4   : > { %v2802_v9 = vpop.eup %2801 }
 0x3b5   : > { %1987 = vst.msk [vmem:[%s3230_s26 + $0x1f8] sm:$0xff] %vm1923_vm10, %v2802_v9 }
 0x3b6   : > { %s3846_s12 = smov (!%p1997_p8, %s1996_s12), 64 }
 0x3b7   : > { %s2425_s18 = sshll.u32 %s3846_s12, 3 }
 0x3b8   : > { %p2428_p9 = scmp.eq.s32.totalorder %s2425_s18, 0 }
 0x3b9   : > { %s3699_s19 = sshrl.u32 (!%p2428_p9), %s3846_s12, 5 }
 0x3ba   : > { %2005 = sbr.rel (%p2428_p9) target bundleno = 1014 (0x3f6), region = 56  ;;  %p2429_p10 = scmp.le.s32.totalorder (!%p2428_p9), %s3699_s19, 0 }
 0x3bf   : > { %2284 = sbr.rel (%p2429_p10) target bundleno = 997 (0x3e5), region = 132  ;;  %s3837_s6 = smov (!%p2429_p10), %s3693_s17 }
 0x3c0   : > { %s3838_s10 = smov (!%p2429_p10), %s3230_s26  ;;  %s3708_s13 = smov (!%p2429_p10), 0  }
 0x3c1   : > { %s3710_s21 = smov (!%p2429_p10), 0  }
 0x3c4 LB: >> { %v2130_v59 = vld [vmem:[%s2872_s10] sm:$0xff]  ;;  %v2132_v11 = vld [vmem:[%s2872_s10 + $0x8] sm:$0xff]  ;;  %v2134_v12 = vld [vmem:[%s2872_s10 + $0x10] sm:$0xff]  ;;  %s2194_s22 = sadd.s32 1, %s2876_s13  ;;  %s2124_s21 = sadd.s32 1, %s2880_s21   ;;  %s2880_s21 = sphi %s3710_s21, %s2124_s21   ;;  %s2876_s13 = sphi %s3708_s13, %s3841_s13   ;;  %s2872_s10 = sphi %s3838_s10, %s3840_s10   ;;  %s2868_s6 = sphi %s3837_s6, %s3839_s6  }
 0x3c5   : >> { %2131 = vst [vmem:[%s2868_s6] sm:$0xff] %v2130_v59  ;;  %v2136_v13 = vld [vmem:[%s2872_s10 + $0x18] sm:$0xff]  ;;  %p2195_p11 = scmp.ge.s32.totalorder %s2194_s22, %s3699_s19  ;;  %v2138_v27 = vld [vmem:[%s2872_s10 + $0x20] sm:$0xff]  ;;  %v2140_v45 = vld [vmem:[%s2872_s10 + $0x28] sm:$0xff]  ;;  %p2123_p12 = scmp.ge.s32.totalorder %s2124_s21, %s3699_s19 }
 0x3c6   : >> { %2133 = vst [vmem:[%s2868_s6 + $0x8] sm:$0xff] %v2132_v11  ;;  %v2142_v14 = vld [vmem:[%s2872_s10 + $0x30] sm:$0xff]  ;;  %v2144_v15 = vld [vmem:[%s2872_s10 + $0x38] sm:$0xff]  ;;  %v2146_v17 = vld [vmem:[%s2872_s10 + $0x40] sm:$0xff] }
 0x3c7   : >> { %2135 = vst [vmem:[%s2868_s6 + $0x10] sm:$0xff] %v2134_v12  ;;  %s3848_s22 = smov (%p2195_p11, %s2194_s22), 0  ;;  %v2148_v20 = vld [vmem:[%s2872_s10 + $0x48] sm:$0xff]  ;;  %v2150_v21 = vld [vmem:[%s2872_s10 + $0x50] sm:$0xff]  ;;  %v2152_v61 = vld [vmem:[%s2872_s10 + $0x58] sm:$0xff] }
 0x3c8   : >> { %2137 = vst [vmem:[%s2868_s6 + $0x18] sm:$0xff] %v2136_v13  ;;  %s2430_s20 = sshll.u32 %s3848_s22, 8  ;;  %v2154_v24 = vld [vmem:[%s2872_s10 + $0x60] sm:$0xff]  ;;  %v2156_v25 = vld [vmem:[%s2872_s10 + $0x68] sm:$0xff]  ;;  %v2158_v22 = vld [vmem:[%s2872_s10 + $0x70] sm:$0xff]  ;;  %s3841_s13 = smov %s3848_s22 }
 0x3c9   : >> { %2139 = vst [vmem:[%s2868_s6 + $0x20] sm:$0xff] %v2138_v27  ;;  %s3742_s23 = scalar_lea.vmem %s3230_s26, %s2430_s20 [#allocation3]   ;;  %s3745_s24 = scalar_lea.vmem %s3693_s17, %s2430_s20   ;;  %v2160_v26 = vld [vmem:[%s2872_s10 + $0x78] sm:$0xff]  ;;  %v2162_v49 = vld [vmem:[%s2872_s10 + $0x80] sm:$0xff]  ;;  %v2164_v62 = vld [vmem:[%s2872_s10 + $0x88] sm:$0xff] }
 0x3ca   : >> { %2141 = vst [vmem:[%s2868_s6 + $0x28] sm:$0xff] %v2140_v45  ;;  %v2166_v31 = vld [vmem:[%s2872_s10 + $0x90] sm:$0xff]  ;;  %v2168_v29 = vld [vmem:[%s2872_s10 + $0x98] sm:$0xff]  ;;  %v2170_v43 = vld [vmem:[%s2872_s10 + $0xa0] sm:$0xff] }
 0x3cb   : >> { %2143 = vst [vmem:[%s2868_s6 + $0x30] sm:$0xff] %v2142_v14  ;;  %v2172_v0 = vld [vmem:[%s2872_s10 + $0xa8] sm:$0xff]  ;;  %v2174_v36 = vld [vmem:[%s2872_s10 + $0xb0] sm:$0xff]  ;;  %v2176_v32 = vld [vmem:[%s2872_s10 + $0xb8] sm:$0xff] }
 0x3cc   : >> { %2145 = vst [vmem:[%s2868_s6 + $0x38] sm:$0xff] %v2144_v15  ;;  %v2178_v5 = vld [vmem:[%s2872_s10 + $0xc0] sm:$0xff]  ;;  %v2180_v33 = vld [vmem:[%s2872_s10 + $0xc8] sm:$0xff]  ;;  %v2182_v34 = vld [vmem:[%s2872_s10 + $0xd0] sm:$0xff] }
 0x3cd   : >> { %2147 = vst [vmem:[%s2868_s6 + $0x40] sm:$0xff] %v2146_v17  ;;  %v2184_v37 = vld [vmem:[%s2872_s10 + $0xd8] sm:$0xff]  ;;  %v2186_v39 = vld [vmem:[%s2872_s10 + $0xe0] sm:$0xff]  ;;  %v2188_v40 = vld [vmem:[%s2872_s10 + $0xe8] sm:$0xff] }
 0x3ce   : >> { %2149 = vst [vmem:[%s2868_s6 + $0x48] sm:$0xff] %v2148_v20  ;;  %v2190_v41 = vld [vmem:[%s2872_s10 + $0xf0] sm:$0xff]  ;;  %v2192_v42 = vld [vmem:[%s2872_s10 + $0xf8] sm:$0xff]  ;;  %s3840_s10 = smov %s3742_s23 }
 0x3cf   : >> { %2151 = vst [vmem:[%s2868_s6 + $0x50] sm:$0xff] %v2150_v21 }
 0x3d0   : >> { %2153 = vst [vmem:[%s2868_s6 + $0x58] sm:$0xff] %v2152_v61 }
 0x3d1   : >> { %2155 = vst [vmem:[%s2868_s6 + $0x60] sm:$0xff] %v2154_v24 }
 0x3d2   : >> { %2157 = vst [vmem:[%s2868_s6 + $0x68] sm:$0xff] %v2156_v25 }
 0x3d3   : >> { %2159 = vst [vmem:[%s2868_s6 + $0x70] sm:$0xff] %v2158_v22 }
 0x3d4   : >> { %2161 = vst [vmem:[%s2868_s6 + $0x78] sm:$0xff] %v2160_v26 }
 0x3d5   : >> { %2163 = vst [vmem:[%s2868_s6 + $0x80] sm:$0xff] %v2162_v49 }
 0x3d6   : >> { %2165 = vst [vmem:[%s2868_s6 + $0x88] sm:$0xff] %v2164_v62 }
 0x3d7   : >> { %2167 = vst [vmem:[%s2868_s6 + $0x90] sm:$0xff] %v2166_v31 }
 0x3d8   : >> { %2169 = vst [vmem:[%s2868_s6 + $0x98] sm:$0xff] %v2168_v29 }
 0x3d9   : >> { %2171 = vst [vmem:[%s2868_s6 + $0xa0] sm:$0xff] %v2170_v43 }
 0x3da   : >> { %2173 = vst [vmem:[%s2868_s6 + $0xa8] sm:$0xff] %v2172_v0 }
 0x3db   : >> { %2175 = vst [vmem:[%s2868_s6 + $0xb0] sm:$0xff] %v2174_v36 }
 0x3dc   : >> { %2177 = vst [vmem:[%s2868_s6 + $0xb8] sm:$0xff] %v2176_v32 }
 0x3dd   : >> { %2179 = vst [vmem:[%s2868_s6 + $0xc0] sm:$0xff] %v2178_v5 }
 0x3de   : >> { %2181 = vst [vmem:[%s2868_s6 + $0xc8] sm:$0xff] %v2180_v33 }
 0x3df   : >> { %2183 = vst [vmem:[%s2868_s6 + $0xd0] sm:$0xff] %v2182_v34 }
 0x3e0   : >> { %2185 = vst [vmem:[%s2868_s6 + $0xd8] sm:$0xff] %v2184_v37  ;;  %2126 = sbr.rel (!%p2123_p12) target bundleno = 964 (0x3c4), region = 138 }
 0x3e1   : >> { %2187 = vst [vmem:[%s2868_s6 + $0xe0] sm:$0xff] %v2186_v39 }
 0x3e2   : >> { %2189 = vst [vmem:[%s2868_s6 + $0xe8] sm:$0xff] %v2188_v40 }
 0x3e3   : >> { %2191 = vst [vmem:[%s2868_s6 + $0xf0] sm:$0xff] %v2190_v41 }
 0x3e4   : >> { %2193 = vst [vmem:[%s2868_s6 + $0xf8] sm:$0xff] %v2192_v42  ;;  %s3839_s6 = smov %s3745_s24 }
 0x3e5 PF: > { %s3810_s25 = sand.u32 31, %s3846_s12   ;;  %s2447_s28 = sshll.u32 %s3699_s19, 8 }
 0x3e6   : > { %s2205_s30 = scalar_lea.vmem %s3230_s26, %s2447_s28 [#allocation3]   ;;  %s2207_s8 = scalar_lea.vmem %s3693_s17, %s2447_s28  }
 0x3e7   : > { %p2435_p13 = scmp.le.s32.totalorder %s3810_s25, 0 }
 0x3e8   : > { %s2882_s11 = smov (!%p2435_p13), %s2207_s8   ;;  %s2886_s14 = smov (!%p2435_p13), %s2205_s30  }
 0x3e9   : > { %2298 = sbr.rel (%p2435_p13) target bundleno = 1014 (0x3f6), region = 143  ;;  %s2890_s15 = smov (!%p2435_p13), 0  }
 0x3ea   : > { %s2894_s16 = smov (!%p2435_p13), 0  }
 0x3ee LB: >> { %v2217_v28 = vld [vmem:[%s2888_s14] sm:$0xff]  ;;  %s2219_s12 = sadd.s32 1, %s2892_s15  ;;  %s2211_s16 = sadd.s32 1, %s2896_s16   ;;  %s2896_s16 = sphi %s2894_s16, %s2211_s16   ;;  %s2892_s15 = sphi %s2890_s15, %s2891_s15   ;;  %s2888_s14 = sphi %s2886_s14, %s2224_s14   ;;  %s2884_s11 = sphi %s2882_s11, %s2225_s11  }
 0x3ef   : >> { %2218 = vst [vmem:[%s2884_s11] sm:$0xff] %v2217_v28  ;;  %p2220_p0 = scmp.ge.s32.totalorder %s2219_s12, %s3810_s25  ;;  %p2210_p1 = scmp.ge.s32.totalorder %s2211_s16, %s3810_s25 }
 0x3f1   : >> { %s3850_s12 = smov (%p2220_p0, %s2219_s12), 0  ;;  %2213 = sbr.rel (!%p2210_p1) target bundleno = 1006 (0x3ee), region = 149 }
 0x3f2   : >> { %s2436_s26 = sshll.u32 %s3850_s12, 3  ;;  %s2891_s15 = smov %s3850_s12  }
 0x3f3   : >> { %s2224_s14 = scalar_lea.vmem %s2205_s30, %s2436_s26 [#allocation3]   ;;  %s2225_s11 = scalar_lea.vmem %s2207_s8, %s2436_s26  }
 0x3f6 PF: > { %p16_p2 = scmp.ge.s32.totalorder %s2956_s29, 4   ;;  %s3842_s26 = smov %s2860_s27 }
 0x3f7   : > { %s3843_s27 = smov %s2964_s9  ;;  %s3844_s28 = smov %s2956_s29 }
 0x3f8   :  { %18 = sbr.rel (!%p16_p2) target bundleno = 5 (0x5), region = 160 }

</bundles_post_ra>
